<compile_context>
chip_gen: v7x
topology: tpu7x:2x2x1
jax: 0.10.0
libtpu: 0.0.40
codegen_flags: <defaults>
</compile_context>

<pallas_src>
import functools
import math

import jax
import jax.numpy as jnp
from jax.experimental import pallas as pl
from jax.experimental.pallas import tpu as pltpu


def _round_up(x, m):
    return ((x + m - 1) // m) * m


# ---------------------------------------------------------------------------
# Pass 1: fused Q/K/V projection + global-reduction accumulators.
# ---------------------------------------------------------------------------
def _make_pass1_kernel(tile_n, f, n_valid):
    def kernel(xq_ref, xs_ref, wq_ref, bq_ref, wk_ref, bk_ref, wv_ref, bv_ref,
               q_out, v_out, ktv_out, ksum_out, qsq_out, ksq_out):
        i = pl.program_id(0)

        @pl.when(i == 0)
        def _init():
            ktv_out[...] = jnp.zeros_like(ktv_out)
            ksum_out[...] = jnp.zeros_like(ksum_out)
            qsq_out[...] = jnp.zeros_like(qsq_out)
            ksq_out[...] = jnp.zeros_like(ksq_out)

        xq = xq_ref[...]
        xs = xs_ref[...]
        q = jnp.dot(xq, wq_ref[...], preferred_element_type=jnp.float32) + bq_ref[...]
        k = jnp.dot(xs, wk_ref[...], preferred_element_type=jnp.float32) + bk_ref[...]
        v = jnp.dot(xs, wv_ref[...], preferred_element_type=jnp.float32) + bv_ref[...]

        # Mask padded rows (their projection equals the bias, which must not leak
        # into the global reductions).
        rows = i * tile_n + jax.lax.broadcasted_iota(jnp.int32, (tile_n, f), 0)
        valid = rows < n_valid
        q = jnp.where(valid, q, 0.0)
        k = jnp.where(valid, k, 0.0)
        v = jnp.where(valid, v, 0.0)

        q_out[...] = q
        v_out[...] = v

        # k^T v for this tile (contract over rows), accumulated across the grid.
        ktv_out[...] += jax.lax.dot_general(
            k, v, dimension_numbers=(((0,), (0,)), ((), ())),
            preferred_element_type=jnp.float32)
        ksum_out[...] += jnp.sum(k, axis=0, keepdims=True)
        qsq_out[...] += jnp.sum(q * q, axis=0, keepdims=True)
        ksq_out[...] += jnp.sum(k * k, axis=0, keepdims=True)

    return kernel


# ---------------------------------------------------------------------------
# Pass 2: apply attention per row tile using the tiny precomputed matrices.
#   num  = q @ kv_bd + N * v                       [tile, F]
#   norm = q @ s_f   + N    (replicated per head)  [tile, F]
#   out  = (num * (1/norm)) @ mean_mat             [tile, D]
# ---------------------------------------------------------------------------
def _make_pass2_kernel(n_valid_f):
    def kernel(q_ref, v_ref, kvbd_ref, sf_ref, mean_ref, o_ref):
        q = q_ref[...]
        v = v_ref[...]
        num = jnp.dot(q, kvbd_ref[...], preferred_element_type=jnp.float32) + n_valid_f * v
        norm = jnp.dot(q, sf_ref[...], preferred_element_type=jnp.float32) + n_valid_f
        inv = pl.reciprocal(norm, approx=True)   # EUP slot -> effectively free
        o_ref[...] = jnp.dot(num * inv, mean_ref[...], preferred_element_type=jnp.float32)

    return kernel


# ---------------------------------------------------------------------------
# Module wrapper (parameter init + the two pallas_calls + tiny glue).
# ---------------------------------------------------------------------------
def init_trans_conv_params(key, in_channels, out_channels, num_heads):
    """PyTorch nn.Linear default init: U(-1/sqrt(fan_in), 1/sqrt(fan_in))."""
    f = out_channels * num_heads
    bound = 1.0 / math.sqrt(in_channels)
    keys = jax.random.split(key, 6)

    def lin(kw, kb):
        w = jax.random.uniform(kw, (f, in_channels), jnp.float32, -bound, bound)
        b = jax.random.uniform(kb, (f,), jnp.float32, -bound, bound)
        return w.T, b.reshape(1, f)  # store W^T [Cin, F] and a row bias [1, F]

    wq_t, bq = lin(keys[0], keys[1])
    wk_t, bk = lin(keys[2], keys[3])
    wv_t, bv = lin(keys[4], keys[5])
    return dict(wq_t=wq_t, bq=bq, wk_t=wk_t, bk=bk, wv_t=wv_t, bv=bv)


@functools.partial(jax.jit, static_argnames=("num_heads", "out_channels", "tile_n"))
def trans_conv_layer_forward(params, query_input, source_input, *,
                             num_heads, out_channels, tile_n=512):
    n, cin = query_input.shape
    f = num_heads * out_channels
    d = out_channels

    tile_n = min(tile_n, _round_up(n, 8))
    n_pad = _round_up(n, tile_n)
    grid_n = n_pad // tile_n

    xq = jnp.pad(query_input.astype(jnp.float32), ((0, n_pad - n), (0, 0)))
    xs = jnp.pad(source_input.astype(jnp.float32), ((0, n_pad - n), (0, 0)))

    row_in_spec = pl.BlockSpec((tile_n, cin), lambda i: (i, 0))
    w_spec = pl.BlockSpec((cin, f), lambda i: (0, 0))
    b_spec = pl.BlockSpec((1, f), lambda i: (0, 0))
    row_f_spec = pl.BlockSpec((tile_n, f), lambda i: (i, 0))
    acc_ff_spec = pl.BlockSpec((f, f), lambda i: (0, 0))
    acc_1f_spec = pl.BlockSpec((1, f), lambda i: (0, 0))

    p1_flops = 2 * n_pad * cin * f * 3 + 2 * n_pad * f * f
    p1_bytes = 4 * (2 * n_pad * cin + 3 * (cin * f + f) + 2 * n_pad * f + f * f + 3 * f)

    q_flat, v_flat, ktv, ksum, qsq, ksq = pl.pallas_call(
        _make_pass1_kernel(tile_n, f, n),
        grid=(grid_n,),
        in_specs=[row_in_spec, row_in_spec, w_spec, b_spec, w_spec, b_spec,
                  w_spec, b_spec],
        out_specs=[row_f_spec, row_f_spec, acc_ff_spec, acc_1f_spec,
                   acc_1f_spec, acc_1f_spec],
        out_shape=[
            jax.ShapeDtypeStruct((n_pad, f), jnp.float32),  # q (un-normalized)
            jax.ShapeDtypeStruct((n_pad, f), jnp.float32),  # v
            jax.ShapeDtypeStruct((f, f), jnp.float32),      # k^T v (all head pairs)
            jax.ShapeDtypeStruct((1, f), jnp.float32),      # sum_l k
            jax.ShapeDtypeStruct((1, f), jnp.float32),      # per-column sum q^2
            jax.ShapeDtypeStruct((1, f), jnp.float32),      # per-column sum k^2
        ],
        compiler_params=pltpu.CompilerParams(
            dimension_semantics=("arbitrary",),             # accumulators -> sequential
            vmem_limit_bytes=32 * 1024 * 1024),
        cost_estimate=pl.CostEstimate(flops=p1_flops, transcendentals=0,
                                      bytes_accessed=p1_bytes),
    )(xq, xs, params["wq_t"], params["bq"], params["wk_t"], params["bk"],
      params["wv_t"], params["bv"])

    # Tiny glue on [1,F]/[F,F] stats: fold 1/(||q||_F * ||k||_F) into the small
    # operator matrices consumed by pass 2 (so no third pass over N is needed).
    scale = jax.lax.rsqrt(jnp.sum(qsq)) * jax.lax.rsqrt(jnp.sum(ksq))
    head_id = jnp.arange(f, dtype=jnp.int32) // d
    same_head = (head_id[:, None] == head_id[None, :]).astype(jnp.float32)   # [F, F]
    kv_bd = ktv * same_head * scale                                          # block-diag kvs
    s_f = ksum.reshape(f, 1) * same_head * scale                             # normalizer matrix
    dim_id = jnp.arange(f, dtype=jnp.int32) % d
    mean_mat = (dim_id[:, None] == jnp.arange(d, dtype=jnp.int32)[None, :]
                ).astype(jnp.float32) / num_heads                            # [F, D] head mean

    p2_flops = 2 * n_pad * f * (2 * f + d) + 3 * n_pad * f
    p2_bytes = 4 * (2 * n_pad * f + 2 * f * f + f * d + n_pad * d)

    out_pad = pl.pallas_call(
        _make_pass2_kernel(float(n)),
        grid=(grid_n,),
        in_specs=[row_f_spec, row_f_spec, acc_ff_spec, acc_ff_spec,
                  pl.BlockSpec((f, d), lambda i: (0, 0))],
        out_specs=pl.BlockSpec((tile_n, d), lambda i: (i, 0)),
        out_shape=jax.ShapeDtypeStruct((n_pad, d), jnp.float32),
        compiler_params=pltpu.CompilerParams(
            dimension_semantics=("parallel",),              # independent rows -> megacore
            vmem_limit_bytes=32 * 1024 * 1024),
        cost_estimate=pl.CostEstimate(flops=p2_flops, transcendentals=n_pad * f,
                                      bytes_accessed=p2_bytes),
    )(q_flat, v_flat, kv_bd, s_f, mean_mat)

    return out_pad[:n]


# ---------------------------------------------------------------------------
# Pure-JAX reference mirroring the PyTorch forward (for a correctness check).
# ---------------------------------------------------------------------------
def _reference_forward(params, query_input, source_input, num_heads, out_channels):
    n = query_input.shape[0]
    q = (query_input @ params["wq_t"] + params["bq"]).reshape(n, num_heads, out_channels)
    k = (source_input @ params["wk_t"] + params["bk"]).reshape(n, num_heads, out_channels)
    v = (source_input @ params["wv_t"] + params["bv"]).reshape(n, num_heads, out_channels)
    qs = q / jnp.linalg.norm(q)
    ks = k / jnp.linalg.norm(k)
    kvs = jnp.einsum("lhm,lhd->hmd", ks, v)
    num = jnp.einsum("nhm,hmd->nhd", qs, kvs) + n * v
    ks_sum = jnp.sum(ks, axis=0)
    norm = jnp.einsum("nhm,hm->nh", qs, ks_sum)[..., None] + n
    return (num / norm).mean(axis=1)


if __name__ == "__main__":
    # Small shapes consistent with the module; F = HEADS * OUT_CH = 128 (one full
    # lane tile), N chosen non-multiple of the row tile to exercise padding/masking.
    N, IN_CH, OUT_CH, HEADS = 300, 64, 32, 4

    key = jax.random.PRNGKey(0)
    k_params, k_q, k_s = jax.random.split(key, 3)

    params = init_trans_conv_params(k_params, IN_CH, OUT_CH, HEADS)
    query_input = jax.random.normal(k_q, (N, IN_CH), jnp.float32)
    source_input = jax.random.normal(k_s, (N, IN_CH), jnp.float32)

    out = trans_conv_layer_forward(params, query_input, source_input,
                                   num_heads=HEADS, out_channels=OUT_CH, tile_n=128)
    out = jax.block_until_ready(out)
    assert out.shape == (N, OUT_CH)

    with jax.default_matmul_precision("highest"):
        ref = _reference_forward(params, query_input, source_input, HEADS, OUT_CH)
    # Tolerance covers TPU matmul-precision differences between the XLA reference
    # path and the MXU passes inside the kernel, plus the approximate EUP reciprocal.
    assert jnp.allclose(out, ref, atol=1e-2, rtol=1e-2), "mismatch vs reference"

    print("KERNEL_OK")
</pallas_src>

<mosaic_0001>
module attributes {stable_mosaic.version = 11 : i64} {
  func.func @kernel(%arg0: i32, %arg1: memref<128x64xf32, #tpu.memory_space<vmem>>, %arg2: memref<128x64xf32, #tpu.memory_space<vmem>>, %arg3: memref<64x128xf32, #tpu.memory_space<vmem>>, %arg4: memref<1x128xf32, #tpu.memory_space<vmem>>, %arg5: memref<64x128xf32, #tpu.memory_space<vmem>>, %arg6: memref<1x128xf32, #tpu.memory_space<vmem>>, %arg7: memref<64x128xf32, #tpu.memory_space<vmem>>, %arg8: memref<1x128xf32, #tpu.memory_space<vmem>>, %arg9: memref<128x128xf32, #tpu.memory_space<vmem>>, %arg10: memref<128x128xf32, #tpu.memory_space<vmem>>, %arg11: memref<128x128xf32, #tpu.memory_space<vmem>>, %arg12: memref<1x128xf32, #tpu.memory_space<vmem>>, %arg13: memref<1x128xf32, #tpu.memory_space<vmem>>, %arg14: memref<1x128xf32, #tpu.memory_space<vmem>>) attributes {dimension_semantics = [#tpu.dimension_semantics<arbitrary>], iteration_bounds = array<i64: 3>, scalar_prefetch = 0 : i64, scratch_operands = 0 : i64, tpu.core_type = #tpu.core_type<tc>, window_params = [{transform_indices = @transform_0, window_bounds = array<i64: 128, 64>}, {transform_indices = @transform_1, window_bounds = array<i64: 128, 64>}, {pipeline_mode = #tpu.pipeline_mode<synchronous>, transform_indices = @transform_2, window_bounds = array<i64: 64, 128>}, {pipeline_mode = #tpu.pipeline_mode<synchronous>, transform_indices = @transform_3, window_bounds = array<i64: 1, 128>}, {pipeline_mode = #tpu.pipeline_mode<synchronous>, transform_indices = @transform_4, window_bounds = array<i64: 64, 128>}, {pipeline_mode = #tpu.pipeline_mode<synchronous>, transform_indices = @transform_5, window_bounds = array<i64: 1, 128>}, {pipeline_mode = #tpu.pipeline_mode<synchronous>, transform_indices = @transform_6, window_bounds = array<i64: 64, 128>}, {pipeline_mode = #tpu.pipeline_mode<synchronous>, transform_indices = @transform_7, window_bounds = array<i64: 1, 128>}, {transform_indices = @transform_8, window_bounds = array<i64: 128, 128>}, {transform_indices = @transform_9, window_bounds = array<i64: 128, 128>}, {pipeline_mode = #tpu.pipeline_mode<synchronous>, transform_indices = @transform_10, window_bounds = array<i64: 128, 128>}, {pipeline_mode = #tpu.pipeline_mode<synchronous>, transform_indices = @transform_11, window_bounds = array<i64: 1, 128>}, {pipeline_mode = #tpu.pipeline_mode<synchronous>, transform_indices = @transform_12, window_bounds = array<i64: 1, 128>}, {pipeline_mode = #tpu.pipeline_mode<synchronous>, transform_indices = @transform_13, window_bounds = array<i64: 1, 128>}]} {
    %c0_i32 = arith.constant 0 : i32
    %0 = arith.cmpi eq, %arg0, %c0_i32 : i32
    %1 = arith.extui %0 : i1 to i32
    %c0_i32_0 = arith.constant 0 : i32
    %2 = arith.cmpi ne, %1, %c0_i32_0 : i32
    scf.if %2 {
      %cst_45 = arith.constant 0.000000e+00 : f32
      %55 = vector.broadcast %cst_45 : f32 to vector<128x128xf32>
      %c0_46 = arith.constant 0 : index
      %c0_47 = arith.constant 0 : index
      %56 = vector.load %arg11[%c0_46, %c0_47] : memref<128x128xf32, #tpu.memory_space<vmem>>, vector<128x128xf32>
      tpu.vector_store %arg11[%c0_46, %c0_47], %55 {strides = array<i32>} : memref<128x128xf32, #tpu.memory_space<vmem>>, vector<128x128xf32>,
      %cst_48 = arith.constant 0.000000e+00 : f32
      %57 = vector.broadcast %cst_48 : f32 to vector<1x128xf32>
      %c0_49 = arith.constant 0 : index
      %c0_50 = arith.constant 0 : index
      %58 = vector.load %arg12[%c0_49, %c0_50] : memref<1x128xf32, #tpu.memory_space<vmem>>, vector<1x128xf32>
      tpu.vector_store %arg12[%c0_49, %c0_50], %57 {strides = array<i32>} : memref<1x128xf32, #tpu.memory_space<vmem>>, vector<1x128xf32>,
      %cst_51 = arith.constant 0.000000e+00 : f32
      %59 = vector.broadcast %cst_51 : f32 to vector<1x128xf32>
      %c0_52 = arith.constant 0 : index
      %c0_53 = arith.constant 0 : index
      %60 = vector.load %arg13[%c0_52, %c0_53] : memref<1x128xf32, #tpu.memory_space<vmem>>, vector<1x128xf32>
      tpu.vector_store %arg13[%c0_52, %c0_53], %59 {strides = array<i32>} : memref<1x128xf32, #tpu.memory_space<vmem>>, vector<1x128xf32>,
      %cst_54 = arith.constant 0.000000e+00 : f32
      %61 = vector.broadcast %cst_54 : f32 to vector<1x128xf32>
      %c0_55 = arith.constant 0 : index
      %c0_56 = arith.constant 0 : index
      %62 = vector.load %arg14[%c0_55, %c0_56] : memref<1x128xf32, #tpu.memory_space<vmem>>, vector<1x128xf32>
      tpu.vector_store %arg14[%c0_55, %c0_56], %61 {strides = array<i32>} : memref<1x128xf32, #tpu.memory_space<vmem>>, vector<1x128xf32>,
    } else {
    }
    %c0 = arith.constant 0 : index
    %c0_1 = arith.constant 0 : index
    %3 = vector.load %arg1[%c0, %c0_1] : memref<128x64xf32, #tpu.memory_space<vmem>>, vector<128x64xf32>
    %c0_2 = arith.constant 0 : index
    %c0_3 = arith.constant 0 : index
    %4 = vector.load %arg2[%c0_2, %c0_3] : memref<128x64xf32, #tpu.memory_space<vmem>>, vector<128x64xf32>
    %c0_4 = arith.constant 0 : index
    %c0_5 = arith.constant 0 : index
    %5 = vector.load %arg3[%c0_4, %c0_5] : memref<64x128xf32, #tpu.memory_space<vmem>>, vector<64x128xf32>
    %cst = arith.constant dense<0.000000e+00> : vector<128x128xf32>
    %6 = tpu.matmul %3, %5, %cst {dimension_numbers = #tpu.dot_dimension_numbers<[1], [0], [0], [1], [0, 0, 1, 1], [], []>} : vector<128x64xf32>, vector<64x128xf32>, vector<128x128xf32> -> vector<128x128xf32>
    %c0_6 = arith.constant 0 : index
    %c0_7 = arith.constant 0 : index
    %7 = vector.load %arg4[%c0_6, %c0_7] : memref<1x128xf32, #tpu.memory_space<vmem>>, vector<1x128xf32>
    %8 = vector.broadcast %7 : vector<1x128xf32> to vector<128x128xf32>
    %9 = arith.addf %6, %8 : vector<128x128xf32>
    %c0_8 = arith.constant 0 : index
    %c0_9 = arith.constant 0 : index
    %10 = vector.load %arg5[%c0_8, %c0_9] : memref<64x128xf32, #tpu.memory_space<vmem>>, vector<64x128xf32>
    %cst_10 = arith.constant dense<0.000000e+00> : vector<128x128xf32>
    %11 = tpu.matmul %4, %10, %cst_10 {dimension_numbers = #tpu.dot_dimension_numbers<[1], [0], [0], [1], [0, 0, 1, 1], [], []>} : vector<128x64xf32>, vector<64x128xf32>, vector<128x128xf32> -> vector<128x128xf32>
    %c0_11 = arith.constant 0 : index
    %c0_12 = arith.constant 0 : index
    %12 = vector.load %arg6[%c0_11, %c0_12] : memref<1x128xf32, #tpu.memory_space<vmem>>, vector<1x128xf32>
    %13 = vector.broadcast %12 : vector<1x128xf32> to vector<128x128xf32>
    %14 = arith.addf %11, %13 : vector<128x128xf32>
    %c0_13 = arith.constant 0 : index
    %c0_14 = arith.constant 0 : index
    %15 = vector.load %arg7[%c0_13, %c0_14] : memref<64x128xf32, #tpu.memory_space<vmem>>, vector<64x128xf32>
    %cst_15 = arith.constant dense<0.000000e+00> : vector<128x128xf32>
    %16 = tpu.matmul %4, %15, %cst_15 {dimension_numbers = #tpu.dot_dimension_numbers<[1], [0], [0], [1], [0, 0, 1, 1], [], []>} : vector<128x64xf32>, vector<64x128xf32>, vector<128x128xf32> -> vector<128x128xf32>
    %c0_16 = arith.constant 0 : index
    %c0_17 = arith.constant 0 : index
    %17 = vector.load %arg8[%c0_16, %c0_17] : memref<1x128xf32, #tpu.memory_space<vmem>>, vector<1x128xf32>
    %18 = vector.broadcast %17 : vector<1x128xf32> to vector<128x128xf32>
    %19 = arith.addf %16, %18 : vector<128x128xf32>
    %c128_i32 = arith.constant 128 : i32
    %20 = arith.muli %arg0, %c128_i32 : i32
    %21 = tpu.iota {dimensions = array<i32: 0>} : vector<128x128xi32>
    %22 = vector.broadcast %20 : i32 to vector<128x128xi32>
    %23 = arith.addi %22, %21 : vector<128x128xi32>
    %c300_i32 = arith.constant 300 : i32
    %24 = vector.broadcast %c300_i32 : i32 to vector<128x128xi32>
    %25 = arith.cmpi slt, %23, %24 : vector<128x128xi32>
    %cst_18 = arith.constant 0.000000e+00 : f32
    %26 = vector.broadcast %cst_18 : f32 to vector<128x128xf32>
    %27 = arith.select %25, %9, %26 : vector<128x128xi1>, vector<128x128xf32>
    %cst_19 = arith.constant 0.000000e+00 : f32
    %28 = vector.broadcast %cst_19 : f32 to vector<128x128xf32>
    %29 = arith.select %25, %14, %28 : vector<128x128xi1>, vector<128x128xf32>
    %cst_20 = arith.constant 0.000000e+00 : f32
    %30 = vector.broadcast %cst_20 : f32 to vector<128x128xf32>
    %31 = arith.select %25, %19, %30 : vector<128x128xi1>, vector<128x128xf32>
    %c0_21 = arith.constant 0 : index
    %c0_22 = arith.constant 0 : index
    %32 = vector.load %arg9[%c0_21, %c0_22] : memref<128x128xf32, #tpu.memory_space<vmem>>, vector<128x128xf32>
    tpu.vector_store %arg9[%c0_21, %c0_22], %27 {strides = array<i32>} : memref<128x128xf32, #tpu.memory_space<vmem>>, vector<128x128xf32>,
    %c0_23 = arith.constant 0 : index
    %c0_24 = arith.constant 0 : index
    %33 = vector.load %arg10[%c0_23, %c0_24] : memref<128x128xf32, #tpu.memory_space<vmem>>, vector<128x128xf32>
    tpu.vector_store %arg10[%c0_23, %c0_24], %31 {strides = array<i32>} : memref<128x128xf32, #tpu.memory_space<vmem>>, vector<128x128xf32>,
    %c0_25 = arith.constant 0 : index
    %c0_26 = arith.constant 0 : index
    %34 = vector.load %arg11[%c0_25, %c0_26] : memref<128x128xf32, #tpu.memory_space<vmem>>, vector<128x128xf32>
    %cst_27 = arith.constant dense<0.000000e+00> : vector<128x128xf32>
    %35 = tpu.matmul %29, %31, %cst_27 {dimension_numbers = #tpu.dot_dimension_numbers<[0], [0], [1], [1], [0, 1, 1, 1], [], []>} : vector<128x128xf32>, vector<128x128xf32>, vector<128x128xf32> -> vector<128x128xf32>
    %36 = arith.addf %34, %35 : vector<128x128xf32>
    %c0_28 = arith.constant 0 : index
    %c0_29 = arith.constant 0 : index
    %37 = vector.load %arg11[%c0_28, %c0_29] : memref<128x128xf32, #tpu.memory_space<vmem>>, vector<128x128xf32>
    tpu.vector_store %arg11[%c0_28, %c0_29], %36 {strides = array<i32>} : memref<128x128xf32, #tpu.memory_space<vmem>>, vector<128x128xf32>,
    %c0_30 = arith.constant 0 : index
    %c0_31 = arith.constant 0 : index
    %38 = vector.load %arg12[%c0_30, %c0_31] : memref<1x128xf32, #tpu.memory_space<vmem>>, vector<1x128xf32>
    %cst_32 = arith.constant dense<0.000000e+00> : vector<128xf32>
    %39 = vector.multi_reduction <add>, %29, %cst_32 [0] : vector<128x128xf32> to vector<128xf32>
    %40 = vector.shape_cast %39 : vector<128xf32> to vector<1x128xf32>
    %41 = arith.addf %38, %40 : vector<1x128xf32>
    %c0_33 = arith.constant 0 : index
    %c0_34 = arith.constant 0 : index
    %42 = vector.load %arg12[%c0_33, %c0_34] : memref<1x128xf32, #tpu.memory_space<vmem>>, vector<1x128xf32>
    tpu.vector_store %arg12[%c0_33, %c0_34], %41 {strides = array<i32>} : memref<1x128xf32, #tpu.memory_space<vmem>>, vector<1x128xf32>,
    %c0_35 = arith.constant 0 : index
    %c0_36 = arith.constant 0 : index
    %43 = vector.load %arg13[%c0_35, %c0_36] : memref<1x128xf32, #tpu.memory_space<vmem>>, vector<1x128xf32>
    %44 = arith.mulf %27, %27 : vector<128x128xf32>
    %cst_37 = arith.constant dense<0.000000e+00> : vector<128xf32>
    %45 = vector.multi_reduction <add>, %44, %cst_37 [0] : vector<128x128xf32> to vector<128xf32>
    %46 = vector.shape_cast %45 : vector<128xf32> to vector<1x128xf32>
    %47 = arith.addf %43, %46 : vector<1x128xf32>
    %c0_38 = arith.constant 0 : index
    %c0_39 = arith.constant 0 : index
    %48 = vector.load %arg13[%c0_38, %c0_39] : memref<1x128xf32, #tpu.memory_space<vmem>>, vector<1x128xf32>
    tpu.vector_store %arg13[%c0_38, %c0_39], %47 {strides = array<i32>} : memref<1x128xf32, #tpu.memory_space<vmem>>, vector<1x128xf32>,
    %c0_40 = arith.constant 0 : index
    %c0_41 = arith.constant 0 : index
    %49 = vector.load %arg14[%c0_40, %c0_41] : memref<1x128xf32, #tpu.memory_space<vmem>>, vector<1x128xf32>
    %50 = arith.mulf %29, %29 : vector<128x128xf32>
    %cst_42 = arith.constant dense<0.000000e+00> : vector<128xf32>
    %51 = vector.multi_reduction <add>, %50, %cst_42 [0] : vector<128x128xf32> to vector<128xf32>
    %52 = vector.shape_cast %51 : vector<128xf32> to vector<1x128xf32>
    %53 = arith.addf %49, %52 : vector<1x128xf32>
    %c0_43 = arith.constant 0 : index
    %c0_44 = arith.constant 0 : index
    %54 = vector.load %arg14[%c0_43, %c0_44] : memref<1x128xf32, #tpu.memory_space<vmem>>, vector<1x128xf32>
    tpu.vector_store %arg14[%c0_43, %c0_44], %53 {strides = array<i32>} : memref<1x128xf32, #tpu.memory_space<vmem>>, vector<1x128xf32>,
    return
  }
  func.func @transform_0(%arg0: i32) -> (i32, i32) {
    %c0_i32 = arith.constant 0 : i32
    %c0_i32_0 = arith.constant 0 : i32
    return %arg0, %c0_i32 : i32, i32
  }
  func.func @transform_1(%arg0: i32) -> (i32, i32) {
    %c0_i32 = arith.constant 0 : i32
    %c0_i32_0 = arith.constant 0 : i32
    return %arg0, %c0_i32 : i32, i32
  }
  func.func @transform_2(%arg0: i32) -> (i32, i32) {
    %c0_i32 = arith.constant 0 : i32
    %c0_i32_0 = arith.constant 0 : i32
    %c0_i32_1 = arith.constant 0 : i32
    return %c0_i32, %c0_i32_0 : i32, i32
  }
  func.func @transform_3(%arg0: i32) -> (i32, i32) {
    %c0_i32 = arith.constant 0 : i32
    %c0_i32_0 = arith.constant 0 : i32
    %c0_i32_1 = arith.constant 0 : i32
    return %c0_i32, %c0_i32_0 : i32, i32
  }
  func.func @transform_4(%arg0: i32) -> (i32, i32) {
    %c0_i32 = arith.constant 0 : i32
    %c0_i32_0 = arith.constant 0 : i32
    %c0_i32_1 = arith.constant 0 : i32
    return %c0_i32, %c0_i32_0 : i32, i32
  }
  func.func @transform_5(%arg0: i32) -> (i32, i32) {
    %c0_i32 = arith.constant 0 : i32
    %c0_i32_0 = arith.constant 0 : i32
    %c0_i32_1 = arith.constant 0 : i32
    return %c0_i32, %c0_i32_0 : i32, i32
  }
  func.func @transform_6(%arg0: i32) -> (i32, i32) {
    %c0_i32 = arith.constant 0 : i32
    %c0_i32_0 = arith.constant 0 : i32
    %c0_i32_1 = arith.constant 0 : i32
    return %c0_i32, %c0_i32_0 : i32, i32
  }
  func.func @transform_7(%arg0: i32) -> (i32, i32) {
    %c0_i32 = arith.constant 0 : i32
    %c0_i32_0 = arith.constant 0 : i32
    %c0_i32_1 = arith.constant 0 : i32
    return %c0_i32, %c0_i32_0 : i32, i32
  }
  func.func @transform_8(%arg0: i32) -> (i32, i32) {
    %c0_i32 = arith.constant 0 : i32
    %c0_i32_0 = arith.constant 0 : i32
    return %arg0, %c0_i32 : i32, i32
  }
  func.func @transform_9(%arg0: i32) -> (i32, i32) {
    %c0_i32 = arith.constant 0 : i32
    %c0_i32_0 = arith.constant 0 : i32
    return %arg0, %c0_i32 : i32, i32
  }
  func.func @transform_10(%arg0: i32) -> (i32, i32) {
    %c0_i32 = arith.constant 0 : i32
    %c0_i32_0 = arith.constant 0 : i32
    %c0_i32_1 = arith.constant 0 : i32
    return %c0_i32, %c0_i32_0 : i32, i32
  }
  func.func @transform_11(%arg0: i32) -> (i32, i32) {
    %c0_i32 = arith.constant 0 : i32
    %c0_i32_0 = arith.constant 0 : i32
    %c0_i32_1 = arith.constant 0 : i32
    return %c0_i32, %c0_i32_0 : i32, i32
  }
  func.func @transform_12(%arg0: i32) -> (i32, i32) {
    %c0_i32 = arith.constant 0 : i32
    %c0_i32_0 = arith.constant 0 : i32
    %c0_i32_1 = arith.constant 0 : i32
    return %c0_i32, %c0_i32_0 : i32, i32
  }
  func.func @transform_13(%arg0: i32) -> (i32, i32) {
    %c0_i32 = arith.constant 0 : i32
    %c0_i32_0 = arith.constant 0 : i32
    %c0_i32_1 = arith.constant 0 : i32
    return %c0_i32, %c0_i32_0 : i32, i32
  }
}

module attributes {stable_mosaic.version = 11 : i64} {
  func.func @kernel(%arg0: i32, %arg1: memref<128x128xf32, #tpu.memory_space<vmem>>, %arg2: memref<128x128xf32, #tpu.memory_space<vmem>>, %arg3: memref<128x128xf32, #tpu.memory_space<vmem>>, %arg4: memref<128x128xf32, #tpu.memory_space<vmem>>, %arg5: memref<128x32xf32, #tpu.memory_space<vmem>>, %arg6: memref<128x32xf32, #tpu.memory_space<vmem>>) attributes {dimension_semantics = [#tpu.dimension_semantics<parallel>], iteration_bounds = array<i64: 3>, scalar_prefetch = 0 : i64, scratch_operands = 0 : i64, tpu.core_type = #tpu.core_type<tc>, window_params = [{transform_indices = @transform_0, window_bounds = array<i64: 128, 128>}, {transform_indices = @transform_1, window_bounds = array<i64: 128, 128>}, {pipeline_mode = #tpu.pipeline_mode<synchronous>, transform_indices = @transform_2, window_bounds = array<i64: 128, 128>}, {pipeline_mode = #tpu.pipeline_mode<synchronous>, transform_indices = @transform_3, window_bounds = array<i64: 128, 128>}, {pipeline_mode = #tpu.pipeline_mode<synchronous>, transform_indices = @transform_4, window_bounds = array<i64: 128, 32>}, {transform_indices = @transform_5, window_bounds = array<i64: 128, 32>}]} {
    %c0 = arith.constant 0 : index
    %c0_0 = arith.constant 0 : index
    %0 = vector.load %arg1[%c0, %c0_0] : memref<128x128xf32, #tpu.memory_space<vmem>>, vector<128x128xf32>
    %c0_1 = arith.constant 0 : index
    %c0_2 = arith.constant 0 : index
    %1 = vector.load %arg2[%c0_1, %c0_2] : memref<128x128xf32, #tpu.memory_space<vmem>>, vector<128x128xf32>
    %c0_3 = arith.constant 0 : index
    %c0_4 = arith.constant 0 : index
    %2 = vector.load %arg3[%c0_3, %c0_4] : memref<128x128xf32, #tpu.memory_space<vmem>>, vector<128x128xf32>
    %cst = arith.constant dense<0.000000e+00> : vector<128x128xf32>
    %3 = tpu.matmul %0, %2, %cst {dimension_numbers = #tpu.dot_dimension_numbers<[1], [0], [0], [1], [0, 0, 1, 1], [], []>} : vector<128x128xf32>, vector<128x128xf32>, vector<128x128xf32> -> vector<128x128xf32>
    %cst_5 = arith.constant 3.000000e+02 : f32
    %4 = vector.broadcast %cst_5 : f32 to vector<128x128xf32>
    %5 = arith.mulf %4, %1 : vector<128x128xf32>
    %6 = arith.addf %3, %5 : vector<128x128xf32>
    %c0_6 = arith.constant 0 : index
    %c0_7 = arith.constant 0 : index
    %7 = vector.load %arg4[%c0_6, %c0_7] : memref<128x128xf32, #tpu.memory_space<vmem>>, vector<128x128xf32>
    %cst_8 = arith.constant dense<0.000000e+00> : vector<128x128xf32>
    %8 = tpu.matmul %0, %7, %cst_8 {dimension_numbers = #tpu.dot_dimension_numbers<[1], [0], [0], [1], [0, 0, 1, 1], [], []>} : vector<128x128xf32>, vector<128x128xf32>, vector<128x128xf32> -> vector<128x128xf32>
    %cst_9 = arith.constant 3.000000e+02 : f32
    %9 = vector.broadcast %cst_9 : f32 to vector<128x128xf32>
    %10 = arith.addf %8, %9 : vector<128x128xf32>
    %11 = tpu.reciprocal %10 {approx = true} : vector<128x128xf32> -> vector<128x128xf32>
    %12 = arith.mulf %6, %11 : vector<128x128xf32>
    %c0_10 = arith.constant 0 : index
    %c0_11 = arith.constant 0 : index
    %13 = vector.load %arg5[%c0_10, %c0_11] : memref<128x32xf32, #tpu.memory_space<vmem>>, vector<128x32xf32>
    %cst_12 = arith.constant dense<0.000000e+00> : vector<128x32xf32>
    %14 = tpu.matmul %12, %13, %cst_12 {dimension_numbers = #tpu.dot_dimension_numbers<[1], [0], [0], [1], [0, 0, 1, 1], [], []>} : vector<128x128xf32>, vector<128x32xf32>, vector<128x32xf32> -> vector<128x32xf32>
    %c0_13 = arith.constant 0 : index
    %c0_14 = arith.constant 0 : index
    %15 = vector.load %arg6[%c0_13, %c0_14] : memref<128x32xf32, #tpu.memory_space<vmem>>, vector<128x32xf32>
    tpu.vector_store %arg6[%c0_13, %c0_14], %14 {strides = array<i32>} : memref<128x32xf32, #tpu.memory_space<vmem>>, vector<128x32xf32>,
    return
  }
  func.func @transform_0(%arg0: i32) -> (i32, i32) {
    %c0_i32 = arith.constant 0 : i32
    %c0_i32_0 = arith.constant 0 : i32
    return %arg0, %c0_i32 : i32, i32
  }
  func.func @transform_1(%arg0: i32) -> (i32, i32) {
    %c0_i32 = arith.constant 0 : i32
    %c0_i32_0 = arith.constant 0 : i32
    return %arg0, %c0_i32 : i32, i32
  }
  func.func @transform_2(%arg0: i32) -> (i32, i32) {
    %c0_i32 = arith.constant 0 : i32
    %c0_i32_0 = arith.constant 0 : i32
    %c0_i32_1 = arith.constant 0 : i32
    return %c0_i32, %c0_i32_0 : i32, i32
  }
  func.func @transform_3(%arg0: i32) -> (i32, i32) {
    %c0_i32 = arith.constant 0 : i32
    %c0_i32_0 = arith.constant 0 : i32
    %c0_i32_1 = arith.constant 0 : i32
    return %c0_i32, %c0_i32_0 : i32, i32
  }
  func.func @transform_4(%arg0: i32) -> (i32, i32) {
    %c0_i32 = arith.constant 0 : i32
    %c0_i32_0 = arith.constant 0 : i32
    %c0_i32_1 = arith.constant 0 : i32
    return %c0_i32, %c0_i32_0 : i32, i32
  }
  func.func @transform_5(%arg0: i32) -> (i32, i32) {
    %c0_i32 = arith.constant 0 : i32
    %c0_i32_0 = arith.constant 0 : i32
    return %arg0, %c0_i32 : i32, i32
  }
}

</mosaic_0001>

<bundles_post_ra>
// kernel: trans_conv_layer_forward.3
= control target key start
LH: loop header
LB: loop body
LE: loop exit
PB: predicated region body
PF: predicated region fallthrough
CT: control target
= control target key end

     0   :  { %s1365_s18 = smov 0   ;;  %s1604_s0 = inlined_call_operand.vmem [shape: f32[384,128], index: 0, kind: input, shape index: {}]   ;;  %s1605_s1 = inlined_call_operand.vmem [shape: f32[384,128], index: 1, kind: input, shape index: {}]   ;;  %s1606_s2 = inlined_call_operand.vmem [shape: f32[128,128], index: 2, kind: input, shape index: {}]   ;;  %s1607_s3 = inlined_call_operand.vmem [shape: f32[128,128], index: 3, kind: input, shape index: {}]   ;;  %s1608_s4 = inlined_call_operand.vmem [shape: f32[128,32], index: 4, kind: input, shape index: {}]   ;;  %s1609_s5 = inlined_call_operand.vmem [shape: f32[384,32], index: 5, kind: output, shape index: {}]  }
   0x1 LB: > { %s898_s19 = sadd.s32 4294967295, %s1333_s18   ;;  %p902_p0 = scmp.ge.s32.totalorder %s1333_s18, 1  ;;  %s1333_s18 = sphi %s1365_s18, %s15_s18  }
   0x2   : > { %p199_p1 = scmp.lt.s32.totalorder %s1333_s18, 4 }
   0x4   : > { %p200_p2 = pnand %p902_p0, %p199_p1 }
   0x5   : > { %v459_v0 = vld [vmem:[%s1607_s3] sm:$0xff] (!%p200_p2)  ;;  %v460_v1 = vld [vmem:[%s1607_s3 + $0x8] sm:$0xff] (!%p200_p2)  ;;  %v461_v2 = vld [vmem:[%s1607_s3 + $0x10] sm:$0xff] (!%p200_p2)  ;;  %s903_s26 = sshll.u32 (!%p200_p2), %s898_s19, 4  ;;  %vm813_vm0 = vcmask (!%p200_p2), 261120  }
   0x6   : > { %203 = sbr.rel (%p200_p2) target bundleno = 512 (0x200), region = 40  ;;  %v1207_v3 = vpack.c.bf16 (!%p200_p2), %v460_v1, %v459_v0  ;;  %v462_v4 = vld [vmem:[%s1607_s3 + $0x18] sm:$0xff] (!%p200_p2)  ;;  %v463_v5 = vld [vmem:[%s1607_s3 + $0x20] sm:$0xff] (!%p200_p2)  ;;  %p233_p3 = scmp.lt.s32.totalorder (!%p200_p2), %s903_s26, 47  ;;  %v464_v7 = vld [vmem:[%s1607_s3 + $0x28] sm:$0xff] (!%p200_p2) }
   0x7   : > { %v1211_v6 = vpack.c.bf16 (!%p200_p2), %v462_v4, %v461_v2  ;;  %v282_v8 = vld [vmem:[%s1606_s2] sm:$0xff] (!%p200_p2)  ;;  %v283_v9 = vld [vmem:[%s1606_s2 + $0x8] sm:$0xff] (!%p200_p2)  ;;  %v284_v11 = vld [vmem:[%s1606_s2 + $0x10] sm:$0xff] (!%p200_p2)  ;;  %v1215_v15 = vpack.c.bf16 (!%p200_p2), %v464_v7, %v463_v5 }
   0x8   : > { %1208 = vmatprep.subr.bf16.mxu1 (!%p200_p2), %v1207_v3  ;;  %v1175_v10 = vpack.c.bf16 (!%p200_p2), %v283_v9, %v282_v8  ;;  %v285_v12 = vld [vmem:[%s1606_s2 + $0x18] sm:$0xff] (!%p200_p2)  ;;  %v286_v14 = vld [vmem:[%s1606_s2 + $0x20] sm:$0xff] (!%p200_p2)  ;;  %v287_v16 = vld [vmem:[%s1606_s2 + $0x28] sm:$0xff] (!%p200_p2) }
   0x9   : > { %1210 = vmatpush3.bf16.msra.mxu1 (!%p200_p2), %v1207_v3  ;;  %v1179_v13 = vpack.c.bf16 (!%p200_p2), %v285_v12, %v284_v11  ;;  %v465_v17 = vld [vmem:[%s1607_s3 + $0x30] sm:$0xff] (!%p200_p2)  ;;  %v466_v18 = vld [vmem:[%s1607_s3 + $0x38] sm:$0xff] (!%p200_p2)  ;;  %v1183_v19 = vpack.c.bf16 (!%p200_p2), %v287_v16, %v286_v14  ;;  %v467_v24 = vld [vmem:[%s1607_s3 + $0x40] sm:$0xff] (!%p200_p2) }
   0xa   : > { %1212 = vmatprep.subr.bf16.mxu1 (!%p200_p2), %v1211_v6  ;;  %1176 = vmatprep.subr.bf16.mxu0 (!%p200_p2), %v1175_v10  ;;  %v288_v20 = vld [vmem:[%s1606_s2 + $0x30] sm:$0xff] (!%p200_p2)  ;;  %v289_v21 = vld [vmem:[%s1606_s2 + $0x38] sm:$0xff] (!%p200_p2)  ;;  %v1219_v22 = vpack.c.bf16 (!%p200_p2), %v466_v18, %v465_v17  ;;  %v468_v25 = vld [vmem:[%s1607_s3 + $0x48] sm:$0xff] (!%p200_p2) }
   0xb   : > { %1178 = vmatpush3.bf16.msra.mxu0 (!%p200_p2), %v1175_v10  ;;  %v1187_v26 = vpack.c.bf16 (!%p200_p2), %v289_v21, %v288_v20  ;;  %v290_v27 = vld [vmem:[%s1606_s2 + $0x40] sm:$0xff] (!%p200_p2)  ;;  %v291_v28 = vld [vmem:[%s1606_s2 + $0x48] sm:$0xff] (!%p200_p2)  ;;  %v1223_v29 = vpack.c.bf16 (!%p200_p2), %v468_v25, %v467_v24  ;;  %v469_v30 = vld [vmem:[%s1607_s3 + $0x50] sm:$0xff] (!%p200_p2) }
   0xc   : > { %1180 = vmatprep.subr.bf16.mxu0 (!%p200_p2), %v1179_v13  ;;  %v470_v31 = vld [vmem:[%s1607_s3 + $0x58] sm:$0xff] (!%p200_p2)  ;;  %v1191_v32 = vpack.c.bf16 (!%p200_p2), %v291_v28, %v290_v27  ;;  %v292_v33 = vld [vmem:[%s1606_s2 + $0x50] sm:$0xff] (!%p200_p2)  ;;  %v471_v36 = vld [vmem:[%s1607_s3 + $0x60] sm:$0xff] (!%p200_p2) }
   0xd   : > { %s1611_s26 = smov (!%p233_p3, %s903_s26), 47  ;;  %1214 = vmatpush3.bf16.msra.mxu1 %v1211_v6  ;;  %v293_v34 = vld [vmem:[%s1606_s2 + $0x58] sm:$0xff]  ;;  %v1227_v35 = vpack.c.bf16 %v470_v31, %v469_v30  ;;  %v472_v37 = vld [vmem:[%s1607_s3 + $0x68] sm:$0xff]  ;;  %v294_v39 = vld [vmem:[%s1606_s2 + $0x60] sm:$0xff] }
   0xe   : > { %s1409_s21 = sshll.u32 %s1611_s26, 3  ;;  %1216 = vmatprep.subr.bf16.mxu1 %v1215_v15  ;;  %v1195_v38 = vpack.c.bf16 %v293_v34, %v292_v33  ;;  %v295_v40 = vld [vmem:[%s1606_s2 + $0x68] sm:$0xff]  ;;  %v1231_v41 = vpack.c.bf16 %v472_v37, %v471_v36  ;;  %v473_v42 = vld [vmem:[%s1607_s3 + $0x70] sm:$0xff]  ;;  %v474_v43 = vld [vmem:[%s1607_s3 + $0x78] sm:$0xff] }
   0xf   : > { %s1421_s29 = scalar_lea.vmem %s1604_s0, %s1409_s21  ;;  %1182 = vmatpush3.bf16.msra.mxu0 %v1179_v13  ;;  %v1199_v44 = vpack.c.bf16 %v295_v40, %v294_v39  ;;  %v296_v45 = vld [vmem:[%s1606_s2 + $0x70] sm:$0xff]  ;;  %v297_v46 = vld [vmem:[%s1606_s2 + $0x78] sm:$0xff]  ;;  %v1235_v47 = vpack.c.bf16 %v474_v43, %v473_v42  ;;  %v652_v49 = vld [vmem:[%s1608_s4] sm:$0xff]  ;;  %s1545_s7 = scalar_lea.vmem %s1605_s1, %s1409_s21 }
  0x10   : > { %v250_v23 = vld [vmem:[%s1421_s29] sm:$0xff]  ;;  %1184 = vmatprep.subr.bf16.mxu0 %v1183_v19  ;;  %v1203_v48 = vpack.c.bf16 %v297_v46, %v296_v45  ;;  %v653_v50 = vld [vmem:[%s1608_s4 + $0x8] sm:$0xff]  ;;  %v654_v53 = vld [vmem:[%s1608_s4 + $0x10] sm:$0xff]  ;;  %s1567_s10 = scalar_lea.vmem %s1609_s5, %s1409_s21 }
  0x11   : > { %1095 = vmatprep.mubr.f32.mxu1 %v250_v23  ;;  %1039 = vmatprep.mubr.f32.mxu0 %v250_v23  ;;  %v1239_v51 = vpack.c.bf16 %v653_v50, %v652_v49  ;;  %v251_v52 = vld [vmem:[%s1421_s29 + $0x8] sm:$0xff]  ;;  %v655_v54 = vld [vmem:[%s1608_s4 + $0x18] sm:$0xff]  ;;  %v252_v55 = vld [vmem:[%s1421_s29 + $0x10] sm:$0xff] }
  0x12   : > { %1218 = vmatpush3.bf16.msra.mxu1 %v1215_v15  ;;  %v1243_v56 = vpack.c.bf16 %v655_v54, %v654_v53  ;;  %v253_v57 = vld [vmem:[%s1421_s29 + $0x18] sm:$0xff]  ;;  %v656_v58 = vld [vmem:[%s1608_s4 + $0x20] sm:$0xff]  ;;  %v657_v59 = vld [vmem:[%s1608_s4 + $0x28] sm:$0xff] }
  0x13   : > { %1220 = vmatprep.subr.bf16.mxu1 %v1219_v22  ;;  %1186 = vmatpush3.bf16.msra.mxu0 %v1183_v19  ;;  %v254_v60 = vld [vmem:[%s1421_s29 + $0x20] sm:$0xff]  ;;  %v1247_v61 = vpack.c.bf16 %v657_v59, %v656_v58  ;;  %v255_v62 = vld [vmem:[%s1421_s29 + $0x28] sm:$0xff]  ;;  %v658_v63 = vld [vmem:[%s1608_s4 + $0x30] sm:$0xff] }
  0x14   : > { %1188 = vmatprep.subr.bf16.mxu0 %v1187_v26  ;;  %v659_v0 = vld [vmem:[%s1608_s4 + $0x38] sm:$0xff]  ;;  %v256_v1 = vld [vmem:[%s1421_s29 + $0x30] sm:$0xff]  ;;  %v258_v4 = vld [vmem:[%s1421_s29 + $0x40] sm:$0xff] }
  0x15   : > { %v1251_v2 = vpack.c.bf16 %v659_v0, %v658_v63  ;;  %v257_v3 = vld [vmem:[%s1421_s29 + $0x38] sm:$0xff]  ;;  %v259_v5 = vld [vmem:[%s1421_s29 + $0x48] sm:$0xff]  ;;  %v260_v6 = vld [vmem:[%s1421_s29 + $0x50] sm:$0xff] }
  0x16   : > { %1222 = vmatpush3.bf16.msra.mxu1 %v1219_v22  ;;  %v261_v7 = vld [vmem:[%s1421_s29 + $0x58] sm:$0xff]  ;;  %v262_v8 = vld [vmem:[%s1421_s29 + $0x60] sm:$0xff]  ;;  %v263_v9 = vld [vmem:[%s1421_s29 + $0x68] sm:$0xff] }
  0x17   : > { %1224 = vmatprep.subr.bf16.mxu1 %v1223_v29  ;;  %1190 = vmatpush3.bf16.msra.mxu0 %v1187_v26  ;;  %v264_v10 = vld [vmem:[%s1421_s29 + $0x70] sm:$0xff]  ;;  %v265_v11 = vld [vmem:[%s1421_s29 + $0x78] sm:$0xff]  ;;  %v660_v12 = vld [vmem:[%s1608_s4 + $0x40] sm:$0xff] }
  0x18   : > { %1192 = vmatprep.subr.bf16.mxu0 %v1191_v32  ;;  %v661_v13 = vld [vmem:[%s1608_s4 + $0x48] sm:$0xff]  ;;  %v662_v15 = vld [vmem:[%s1608_s4 + $0x50] sm:$0xff]  ;;  %v663_v16 = vld [vmem:[%s1608_s4 + $0x58] sm:$0xff] }
  0x19   : > { %v1255_v14 = vpack.c.bf16 %v661_v13, %v660_v12  ;;  %v1259_v17 = vpack.c.bf16 %v663_v16, %v662_v15  ;;  %v664_v18 = vld [vmem:[%s1608_s4 + $0x60] sm:$0xff]  ;;  %v665_v19 = vld [vmem:[%s1608_s4 + $0x68] sm:$0xff]  ;;  %v666_v21 = vld [vmem:[%s1608_s4 + $0x70] sm:$0xff] }
  0x1a   : > { %1226 = vmatpush3.bf16.msra.mxu1 %v1223_v29  ;;  %v1263_v20 = vpack.c.bf16 %v665_v19, %v664_v18  ;;  %v667_v22 = vld [vmem:[%s1608_s4 + $0x78] sm:$0xff]  ;;  %v267_v29 = vld [vmem:[%s1545_s7 + $0x8] sm:$0xff]  ;;  %v268_v42 = vld [vmem:[%s1545_s7 + $0x10] sm:$0xff] }
  0x1b   : > { %1228 = vmatprep.subr.bf16.mxu1 %v1227_v35  ;;  %1194 = vmatpush3.bf16.msra.mxu0 %v1191_v32  ;;  %v1267_v23 = vpack.c.bf16 %v667_v22, %v666_v21  ;;  %v266_v32 = vld [vmem:[%s1545_s7] sm:$0xff]  ;;  %v299_v36 = vmul.f32 300.0, %v267_v29  ;;  %v269_v39 = vld [vmem:[%s1545_s7 + $0x18] sm:$0xff]  ;;  %v300_v50 = vmul.f32 300.0, %v268_v42  ;;  %v275_v19 = vld [vmem:[%s1545_s7 + $0x48] sm:$0xff] }
  0x1c   : > { %1196 = vmatprep.subr.bf16.mxu0 %v1195_v38  ;;  %v270_v54 = vld [vmem:[%s1545_s7 + $0x20] sm:$0xff] }
  0x1d   : > { %v274_v22 = vld [vmem:[%s1545_s7 + $0x40] sm:$0xff] }
  0x1e   : > { %1230 = vmatpush3.bf16.msra.mxu1 %v1227_v35 }
  0x1f   : > { %1232 = vmatprep.subr.bf16.mxu1 %v1231_v41  ;;  %1198 = vmatpush3.bf16.msra.mxu0 %v1195_v38  ;;  %v298_v38 = vmul.f32 300.0, %v266_v32 }
  0x20   : > { %1200 = vmatprep.subr.bf16.mxu0 %v1199_v44 }
  0x22   : > { %1234 = vmatpush3.bf16.msra.mxu1 %v1231_v41 }
  0x23   : > { %1236 = vmatprep.subr.bf16.mxu1 %v1235_v47  ;;  %1202 = vmatpush3.bf16.msra.mxu0 %v1199_v44 }
  0x24   : > { %1204 = vmatprep.subr.bf16.mxu0 %v1203_v48 }
  0x26   : > { %1238 = vmatpush3.bf16.msra.mxu1 %v1235_v47  ;;  %v301_v47 = vmul.f32 300.0, %v269_v39 }
  0x27   : > { %1271 = vmatprep.subr.bf16.mxu1 %v1239_v51  ;;  %1206 = vmatpush3.bf16.msra.mxu0 %v1203_v48 }
  0x28   : > { %1240 = vmatprep.subr.bf16.mxu0 %v1239_v51 }
  0x29   : > { %1096 = vmatmul.mubr.f32.vlgmr.msra.gmra.mrb[0].mxu1 %v251_v52 }
  0x2a   : > { %1098 = vmatprep.mubr.f32.mxu1 %v252_v55  ;;  %1279 = vmatpush3.bf16.msra.mxu1 %v1239_v51 }
  0x2b   : > { %1040 = vmatmul.mubr.f32.vlgmr.msra.gmra.mrb[0].mxu0 %v251_v52  ;;  %1272 = vmatprep.subr.bf16.mxu1 %v1243_v56 }
  0x2c   : > { %1042 = vmatprep.mubr.f32.mxu0 %v252_v55  ;;  %1242 = vmatpush3.bf16.msra.mxu0 %v1239_v51  ;;  %v271_v51 = vld [vmem:[%s1545_s7 + $0x28] sm:$0xff] }
  0x2d   : > { %1099 = vmatmul.mubr.f32.gmra.mrb[2].mxu1 %v253_v57  ;;  %1244 = vmatprep.subr.bf16.mxu0 %v1243_v56 }
  0x2e   : > { %1101 = vmatprep.mubr.f32.mxu1 %v254_v60  ;;  %1280 = vmatpush3.bf16.msra.mxu1 %v1243_v56 }
  0x2f   : > { %1043 = vmatmul.mubr.f32.gmra.mrb[2].mxu0 %v253_v57  ;;  %1273 = vmatprep.subr.bf16.mxu1 %v1247_v61 }
  0x30   : > { %1045 = vmatprep.mubr.f32.mxu0 %v254_v60  ;;  %1246 = vmatpush3.bf16.msra.mxu0 %v1243_v56 }
  0x31   : > { %1102 = vmatmul.mubr.f32.gmra.mrb[4].mxu1 %v255_v62  ;;  %1248 = vmatprep.subr.bf16.mxu0 %v1247_v61 }
  0x32   : > { %1104 = vmatprep.mubr.f32.mxu1 %v256_v1  ;;  %1281 = vmatpush3.bf16.msra.mxu1 %v1247_v61 }
  0x33   : > { %1046 = vmatmul.mubr.f32.gmra.mrb[4].mxu0 %v255_v62  ;;  %1274 = vmatprep.subr.bf16.mxu1 %v1251_v2  ;;  %v303_v62 = vmul.f32 300.0, %v271_v51  ;;  %v279_v51 = vld [vmem:[%s1545_s7 + $0x68] sm:$0xff] }
  0x34   : > { %1048 = vmatprep.mubr.f32.mxu0 %v256_v1  ;;  %1250 = vmatpush3.bf16.msra.mxu0 %v1247_v61 }
  0x35   : > { %1105 = vmatmul.mubr.f32.gmra.mrb[6].mxu1 %v257_v3  ;;  %1252 = vmatprep.subr.bf16.mxu0 %v1251_v2 }
  0x36   : > { %1107 = vmatprep.mubr.f32.mxu1 %v258_v4  ;;  %1282 = vmatpush3.bf16.msra.mxu1 %v1251_v2 }
  0x37   : > { %1049 = vmatmul.mubr.f32.gmra.mrb[6].mxu0 %v257_v3  ;;  %1275 = vmatprep.subr.bf16.mxu1 %v1255_v14  ;;  %v273_v3 = vld [vmem:[%s1545_s7 + $0x38] sm:$0xff] }
  0x38   : > { %1051 = vmatprep.mubr.f32.mxu0 %v258_v4  ;;  %1254 = vmatpush3.bf16.msra.mxu0 %v1251_v2  ;;  %v302_v2 = vmul.f32 300.0, %v270_v54  ;;  %v278_v54 = vld [vmem:[%s1545_s7 + $0x60] sm:$0xff] }
  0x39   : > { %1108 = vmatmul.mubr.f32.gmra.mrb[8].mxu1 %v259_v5  ;;  %1256 = vmatprep.subr.bf16.mxu0 %v1255_v14 }
  0x3a   : > { %1110 = vmatprep.mubr.f32.mxu1 %v260_v6  ;;  %1283 = vmatpush3.bf16.msra.mxu1 %v1255_v14 }
  0x3b   : > { %1052 = vmatmul.mubr.f32.gmra.mrb[8].mxu0 %v259_v5  ;;  %1276 = vmatprep.subr.bf16.mxu1 %v1259_v17 }
  0x3c   : > { %1054 = vmatprep.mubr.f32.mxu0 %v260_v6  ;;  %1258 = vmatpush3.bf16.msra.mxu0 %v1255_v14  ;;  %v272_v6 = vld [vmem:[%s1545_s7 + $0x30] sm:$0xff]  ;;  %v305_v14 = vmul.f32 300.0, %v273_v3  ;;  %v281_v3 = vld [vmem:[%s1545_s7 + $0x78] sm:$0xff] }
  0x3d   : > { %1111 = vmatmul.mubr.f32.gmra.mrb[10].mxu1 %v261_v7  ;;  %1260 = vmatprep.subr.bf16.mxu0 %v1259_v17  ;;  %v304_v18 = vmul.f32 300.0, %v272_v6 }
  0x3e   : > { %1113 = vmatprep.mubr.f32.mxu1 %v262_v8  ;;  %1284 = vmatpush3.bf16.msra.mxu1 %v1259_v17 }
  0x3f   : > { %1055 = vmatmul.mubr.f32.gmra.mrb[10].mxu0 %v261_v7  ;;  %1277 = vmatprep.subr.bf16.mxu1 %v1263_v20 }
  0x40   : > { %1057 = vmatprep.mubr.f32.mxu0 %v262_v8  ;;  %1262 = vmatpush3.bf16.msra.mxu0 %v1259_v17 }
  0x41   : > { %1114 = vmatmul.mubr.f32.gmra.mrb[12].mxu1 %v263_v9  ;;  %1264 = vmatprep.subr.bf16.mxu0 %v1263_v20 }
  0x42   : > { %1116 = vmatprep.mubr.f32.mxu1 %v264_v10  ;;  %1285 = vmatpush3.bf16.msra.mxu1 %v1263_v20 }
  0x43   : > { %1058 = vmatmul.mubr.f32.gmra.mrb[12].mxu0 %v263_v9  ;;  %1278 = vmatprep.subr.bf16.mxu1 %v1267_v23 }
  0x44   : > { %1060 = vmatprep.mubr.f32.mxu0 %v264_v10  ;;  %1266 = vmatpush3.bf16.msra.mxu0 %v1263_v20 }
  0x45   : > { %1117 = vmatmul.mubr.f32.gmra.mrb[14].mxu1 %v265_v11  ;;  %1268 = vmatprep.subr.bf16.mxu0 %v1267_v23 }
  0x46   : > { %1286 = vmatpush3.bf16.msra.mxu1 %v1267_v23 }
  0x47   : > { %1061 = vmatmul.mubr.f32.gmra.mrb[14].mxu0 %v265_v11 }
  0x48   : > { %1270 = vmatpush3.bf16.msra.mxu0 %v1267_v23 }
  0xfc   : > { %v1097_v24 = vpop.f32.mrb[0].mxu1 }
  0xfd   : > { %v547_v25 = vadd.f32 300.0, %v1097_v24  ;;  %v541_v26 = vpop.f32.mrb[1].mxu1 }
  0xfe   : > { %v542_v27 = vadd.f32 300.0, %v541_v26  ;;  %v1041_v28 = vpop.f32.mrb[0].mxu0 }
  0xff   : > { %1295 = vrcp.f32 %v547_v25  ;;  %v380_v30 = vpop.f32.mrb[1].mxu0  ;;  %v386_v46 = vadd.f32 %v1041_v28, %v299_v36 }
 0x100   : > { %1297 = vrcp.f32 %v542_v27  ;;  %v1100_v31 = vpop.f32.mrb[2].mxu1  ;;  %v381_v49 = vadd.f32 %v380_v30, %v298_v38  ;;  %v307_v30 = vmul.f32 300.0, %v275_v19  ;;  %v276_v38 = vld [vmem:[%s1545_s7 + $0x50] sm:$0xff] }
 0x101   : > { %v557_v33 = vadd.f32 300.0, %v1100_v31  ;;  %v551_v34 = vpop.f32.mrb[3].mxu1 }
 0x102   : > { %v552_v35 = vadd.f32 300.0, %v551_v34  ;;  %v1044_v37 = vpop.f32.mrb[2].mxu0  ;;  %v306_v34 = vmul.f32 300.0, %v274_v22 }
 0x103   : > { %1299 = vrcp.f32 %v557_v33  ;;  %v390_v40 = vpop.f32.mrb[3].mxu0  ;;  %v396_v61 = vadd.f32 %v1044_v37, %v301_v47 }
 0x104   : > { %1301 = vrcp.f32 %v552_v35  ;;  %v1103_v41 = vpop.f32.mrb[4].mxu1  ;;  %v391_v1 = vadd.f32 %v390_v40, %v300_v50  ;;  %v277_v35 = vld [vmem:[%s1545_s7 + $0x58] sm:$0xff]  ;;  %v308_v50 = vmul.f32 300.0, %v276_v38 }
 0x105   : > { %v567_v43 = vadd.f32 300.0, %v1103_v41  ;;  %v561_v44 = vpop.f32.mrb[5].mxu1 }
 0x106   : > { %v562_v45 = vadd.f32 300.0, %v561_v44  ;;  %v1047_v48 = vpop.f32.mrb[4].mxu0 }
 0x107   : > { %1303 = vrcp.f32 %v567_v43  ;;  %v400_v52 = vpop.f32.mrb[5].mxu0  ;;  %v406_v13 = vadd.f32 %v1047_v48, %v303_v62  ;;  %v311_v62 = vmul.f32 300.0, %v279_v51 }
 0x108   : > { %1305 = vrcp.f32 %v562_v45  ;;  %v1106_v53 = vpop.f32.mrb[6].mxu1  ;;  %v401_v17 = vadd.f32 %v400_v52, %v302_v2  ;;  %v310_v2 = vmul.f32 300.0, %v278_v54 }
 0x109   : > { %v1296_v55 = vpop.eup %1295  ;;  %v577_v56 = vadd.f32 300.0, %v1106_v53  ;;  %v571_v57 = vpop.f32.mrb[7].mxu1 }
 0x10a   : > { %v1298_v58 = vpop.eup %1297  ;;  %v637_v59 = vmul.f32 %v1296_v55, %v386_v46  ;;  %v572_v60 = vadd.f32 300.0, %v571_v57  ;;  %v1050_v63 = vpop.f32.mrb[6].mxu0  ;;  %v309_v46 = vmul.f32 300.0, %v277_v35 }
 0x10b   : > { %v636_v0 = vmul.f32 %v1298_v58, %v381_v49  ;;  %1307 = vrcp.f32 %v577_v56  ;;  %v410_v4 = vpop.f32.mrb[7].mxu0  ;;  %v416_v29 = vadd.f32 %v1050_v63, %v305_v14 }
 0x10c   : > { %1309 = vrcp.f32 %v572_v60  ;;  %v1109_v5 = vpop.f32.mrb[8].mxu1  ;;  %v411_v33 = vadd.f32 %v410_v4, %v304_v18 }
 0x10d   : > { %v1300_v7 = vpop.eup %1299  ;;  %v587_v8 = vadd.f32 300.0, %v1109_v5  ;;  %v581_v9 = vpop.f32.mrb[9].mxu1  ;;  %1151 = vmatprep.mubr.f32.mxu0 %v636_v0  ;;  %v280_v5 = vld [vmem:[%s1545_s7 + $0x70] sm:$0xff] }
 0x10e   : > { %v1302_v10 = vpop.eup %1301  ;;  %v639_v11 = vmul.f32 %v1300_v7, %v396_v61  ;;  %v582_v12 = vadd.f32 300.0, %v581_v9  ;;  %1152 = vmatmul.mubr.f32.vlgmr.msra.gmra.mrb[16].mxu0 %v637_v59  ;;  %v1053_v15 = vpop.f32.mrb[8].mxu0 }
 0x10f   : > { %v638_v16 = vmul.f32 %v1302_v10, %v391_v1  ;;  %1311 = vrcp.f32 %v587_v8  ;;  %v420_v20 = vpop.f32.mrb[9].mxu0  ;;  %v426_v45 = vadd.f32 %v1053_v15, %v307_v30  ;;  %v313_v10 = vmul.f32 300.0, %v281_v3 }
 0x110   : > { %1313 = vrcp.f32 %v582_v12  ;;  %v1112_v21 = vpop.f32.mrb[10].mxu1  ;;  %v421_v49 = vadd.f32 %v420_v20, %v306_v34 }
 0x111   : > { %v1304_v23 = vpop.eup %1303  ;;  %v597_v24 = vadd.f32 300.0, %v1112_v21  ;;  %v591_v25 = vpop.f32.mrb[11].mxu1  ;;  %1154 = vmatprep.mubr.f32.mxu0 %v638_v16 }
 0x112   : > { %v1306_v26 = vpop.eup %1305  ;;  %v641_v27 = vmul.f32 %v1304_v23, %v406_v13  ;;  %v592_v28 = vadd.f32 300.0, %v591_v25  ;;  %1155 = vmatmul.mubr.f32.gmra.mrb[18].mxu0 %v639_v11  ;;  %v1056_v31 = vpop.f32.mrb[10].mxu0  ;;  %v312_v13 = vmul.f32 300.0, %v280_v5 }
 0x113   : > { %v640_v32 = vmul.f32 %v1306_v26, %v401_v17  ;;  %1315 = vrcp.f32 %v597_v24  ;;  %v430_v36 = vpop.f32.mrb[11].mxu0  ;;  %v436_v61 = vadd.f32 %v1056_v31, %v309_v46 }
 0x114   : > { %1317 = vrcp.f32 %v592_v28  ;;  %v1115_v37 = vpop.f32.mrb[12].mxu1  ;;  %v431_v1 = vadd.f32 %v430_v36, %v308_v50 }
 0x115   : > { %v1308_v39 = vpop.eup %1307  ;;  %v607_v40 = vadd.f32 300.0, %v1115_v37  ;;  %v601_v41 = vpop.f32.mrb[13].mxu1  ;;  %1157 = vmatprep.mubr.f32.mxu0 %v640_v32 }
 0x116   : > { %v1310_v42 = vpop.eup %1309  ;;  %v643_v43 = vmul.f32 %v1308_v39, %v416_v29  ;;  %v602_v44 = vadd.f32 300.0, %v601_v41  ;;  %1158 = vmatmul.mubr.f32.gmra.mrb[20].mxu0 %v641_v27  ;;  %v1059_v47 = vpop.f32.mrb[12].mxu0 }
 0x117   : > { %v642_v48 = vmul.f32 %v1310_v42, %v411_v33  ;;  %1319 = vrcp.f32 %v607_v40  ;;  %v440_v52 = vpop.f32.mrb[13].mxu0  ;;  %v446_v9 = vadd.f32 %v1059_v47, %v311_v62 }
 0x118   : > { %1321 = vrcp.f32 %v602_v44  ;;  %v1118_v53 = vpop.f32.mrb[14].mxu1  ;;  %v441_v12 = vadd.f32 %v440_v52, %v310_v2 }
 0x119   : > { %v1312_v55 = vpop.eup %1311  ;;  %v617_v56 = vadd.f32 300.0, %v1118_v53  ;;  %v611_v57 = vpop.f32.mrb[15].mxu1  ;;  %1160 = vmatprep.mubr.f32.mxu0 %v642_v48 }
 0x11a   : > { %v1314_v58 = vpop.eup %1313  ;;  %v645_v59 = vmul.f32 %v1312_v55, %v426_v45  ;;  %v612_v60 = vadd.f32 300.0, %v611_v57  ;;  %1161 = vmatmul.mubr.f32.gmra.mrb[22].mxu0 %v643_v43  ;;  %v1062_v63 = vpop.f32.mrb[14].mxu0 }
 0x11b   : > { %v644_v0 = vmul.f32 %v1314_v58, %v421_v49  ;;  %1323 = vrcp.f32 %v617_v56  ;;  %v450_v4 = vpop.f32.mrb[15].mxu0  ;;  %v456_v17 = vadd.f32 %v1062_v63, %v313_v10 }
 0x11c   : > { %1325 = vrcp.f32 %v612_v60  ;;  %v451_v19 = vadd.f32 %v450_v4, %v312_v13 }
 0x11d   : > { %v1316_v6 = vpop.eup %1315  ;;  %1163 = vmatprep.mubr.f32.mxu1 %v644_v0 }
 0x11e   : > { %v1318_v7 = vpop.eup %1317  ;;  %v647_v8 = vmul.f32 %v1316_v6, %v436_v61  ;;  %1164 = vmatmul.mubr.f32.vlgmr.msra.gmra.mrb[16].mxu1 %v645_v59 }
 0x11f   : > { %v646_v11 = vmul.f32 %v1318_v7, %v431_v1 }
 0x121   : > { %v1320_v14 = vpop.eup %1319  ;;  %1166 = vmatprep.mubr.f32.mxu1 %v646_v11 }
 0x122   : > { %v1322_v15 = vpop.eup %1321  ;;  %v649_v16 = vmul.f32 %v1320_v14, %v446_v9  ;;  %1167 = vmatmul.mubr.f32.gmra.mrb[18].mxu1 %v647_v8 }
 0x123   : > { %v648_v18 = vmul.f32 %v1322_v15, %v441_v12 }
 0x125   : > { %v1324_v20 = vpop.eup %1323  ;;  %1169 = vmatprep.mubr.f32.mxu1 %v648_v18 }
 0x126   : > { %v1326_v21 = vpop.eup %1325  ;;  %v651_v22 = vmul.f32 %v1324_v20, %v456_v17  ;;  %1170 = vmatmul.mubr.f32.gmra.mrb[20].mxu1 %v649_v16 }
 0x127   : > { %v650_v23 = vmul.f32 %v1326_v21, %v451_v19 }
 0x129   : > { %1172 = vmatprep.mubr.f32.mxu1 %v650_v23 }
 0x12a   : > { %1173 = vmatmul.mubr.f32.gmra.mrb[22].mxu1 %v651_v22 }
 0x1e1   : > { %v1153_v24 = vpop.f32.mrb[16].mxu0 }
 0x1e2   : > { %815 = vst.msk [vmem:[%s1567_s10 + $0x8] sm:$0xff] %vm813_vm0, %v1153_v24  ;;  %v734_v25 = vpop.f32.mrb[17].mxu0 }
 0x1e3   : > { %814 = vst.msk [vmem:[%s1567_s10] sm:$0xff] %vm813_vm0, %v734_v25 }
 0x1e5   : > { %v1156_v26 = vpop.f32.mrb[18].mxu0 }
 0x1e6   : > { %817 = vst.msk [vmem:[%s1567_s10 + $0x18] sm:$0xff] %vm813_vm0, %v1156_v26  ;;  %v744_v27 = vpop.f32.mrb[19].mxu0 }
 0x1e7   : > { %816 = vst.msk [vmem:[%s1567_s10 + $0x10] sm:$0xff] %vm813_vm0, %v744_v27 }
 0x1e9   : > { %v1159_v28 = vpop.f32.mrb[20].mxu0 }
 0x1ea   : > { %819 = vst.msk [vmem:[%s1567_s10 + $0x28] sm:$0xff] %vm813_vm0, %v1159_v28  ;;  %v754_v29 = vpop.f32.mrb[21].mxu0 }
 0x1eb   : > { %818 = vst.msk [vmem:[%s1567_s10 + $0x20] sm:$0xff] %vm813_vm0, %v754_v29 }
 0x1ed   : > { %v1162_v30 = vpop.f32.mrb[22].mxu0 }
 0x1ee   : > { %821 = vst.msk [vmem:[%s1567_s10 + $0x38] sm:$0xff] %vm813_vm0, %v1162_v30  ;;  %v764_v31 = vpop.f32.mrb[23].mxu0 }
 0x1ef   : > { %820 = vst.msk [vmem:[%s1567_s10 + $0x30] sm:$0xff] %vm813_vm0, %v764_v31 }
 0x1f1   : > { %v1165_v32 = vpop.f32.mrb[16].mxu1 }
 0x1f2   : > { %823 = vst.msk [vmem:[%s1567_s10 + $0x48] sm:$0xff] %vm813_vm0, %v1165_v32  ;;  %v774_v33 = vpop.f32.mrb[17].mxu1 }
 0x1f3   : > { %822 = vst.msk [vmem:[%s1567_s10 + $0x40] sm:$0xff] %vm813_vm0, %v774_v33 }
 0x1f5   : > { %v1168_v34 = vpop.f32.mrb[18].mxu1 }
 0x1f6   : > { %825 = vst.msk [vmem:[%s1567_s10 + $0x58] sm:$0xff] %vm813_vm0, %v1168_v34  ;;  %v784_v35 = vpop.f32.mrb[19].mxu1 }
 0x1f7   : > { %824 = vst.msk [vmem:[%s1567_s10 + $0x50] sm:$0xff] %vm813_vm0, %v784_v35 }
 0x1f9   : > { %v1171_v36 = vpop.f32.mrb[20].mxu1 }
 0x1fa   : > { %827 = vst.msk [vmem:[%s1567_s10 + $0x68] sm:$0xff] %vm813_vm0, %v1171_v36  ;;  %v794_v37 = vpop.f32.mrb[21].mxu1 }
 0x1fb   : > { %826 = vst.msk [vmem:[%s1567_s10 + $0x60] sm:$0xff] %vm813_vm0, %v794_v37 }
 0x1fd   : > { %v1174_v38 = vpop.f32.mrb[22].mxu1 }
 0x1fe   : > { %829 = vst.msk [vmem:[%s1567_s10 + $0x78] sm:$0xff] %vm813_vm0, %v1174_v38  ;;  %v804_v39 = vpop.f32.mrb[23].mxu1 }
 0x1ff   : > { %828 = vst.msk [vmem:[%s1567_s10 + $0x70] sm:$0xff] %vm813_vm0, %v804_v39 }
 0x200 PF: > { %s15_s18 = sadd.s32 1, %s1333_s18  }
 0x201   : > { %p12_p4 = scmp.ge.s32.totalorder %s15_s18, 5  }
 0x203   :  { %14 = sbr.rel (!%p12_p4) target bundleno = 1 (0x1), region = 73 }

// kernel: trans_conv_layer_forward.2
= control target key start
LH: loop header
LB: loop body
LE: loop exit
PB: predicated region body
PF: predicated region fallthrough
CT: control target
= control target key end

     0   :  { %s2234_s25 = smov 0   ;;  %s3014_s0 = inlined_call_operand.vmem [shape: f32[384,64], index: 0, kind: input, shape index: {}]   ;;  %s3015_s1 = inlined_call_operand.vmem [shape: f32[384,64], index: 1, kind: input, shape index: {}]   ;;  %s3016_s2 = inlined_call_operand.vmem [shape: f32[64,128], index: 2, kind: input, shape index: {}]   ;;  %s3017_s3 = inlined_call_operand.vmem [shape: f32[1,128], index: 3, kind: input, shape index: {}]   ;;  %s3018_s4 = inlined_call_operand.vmem [shape: f32[64,128], index: 4, kind: input, shape index: {}]   ;;  %s3019_s5 = inlined_call_operand.vmem [shape: f32[1,128], index: 5, kind: input, shape index: {}]   ;;  %s3020_s6 = inlined_call_operand.vmem [shape: f32[64,128], index: 6, kind: input, shape index: {}]   ;;  %s3021_s7 = inlined_call_operand.vmem [shape: f32[1,128], index: 7, kind: input, shape index: {}]   ;;  %s3022_s8 = inlined_call_operand.vmem [shape: f32[384,128], index: 8, kind: output, shape index: {0}]   ;;  %s3023_s9 = inlined_call_operand.vmem [shape: f32[384,128], index: 9, kind: output, shape index: {1}]   ;;  %s3024_s10 = inlined_call_operand.vmem [shape: f32[128,128], index: 10, kind: output, shape index: {2}]   ;;  %s3025_s11 = inlined_call_operand.vmem [shape: f32[1,128], index: 11, kind: output, shape index: {3}]   ;;  %s3026_s12 = inlined_call_operand.vmem [shape: f32[1,128], index: 12, kind: output, shape index: {4}]   ;;  %s3027_s13 = inlined_call_operand.vmem [shape: f32[1,128], index: 13, kind: output, shape index: {5}]  }
   0x1   :  { %3029 = sst [smem:[#allocation2_spill]] %s3014_s0 }
   0x2 LB: > { %s2240_s26 = sadd.s32 4294967295, %s2161_s25   ;;  %p1690_p0 = scmp.ge.s32.totalorder %s2161_s25, 1  ;;  %s2161_s25 = sphi %s2234_s25, %s24_s25  }
   0x3   : > { %p390_p1 = scmp.lt.s32.totalorder %s2161_s25, 4 }
   0x5   : > { %p391_p2 = pnand %p1690_p0, %p390_p1 }
   0x6   : > { %s1691_s27 = sshll.u32 (!%p391_p2), %s2240_s26, 4  ;;  %s3030_s0 = sld [smem:[#allocation2_spill]] (!%p391_p2) }
   0x7   : > { %394 = sbr.rel (%p391_p2) target bundleno = 666 (0x29a), region = 52  ;;  %p445_p3 = scmp.lt.s32.totalorder (!%p391_p2), %s1691_s27, 47 }
   0x8   : > { %p1699_p4 = scmp.ne.s32.totalorder (!%p391_p2), %s2240_s26, 0 }
   0xe   : > { %s3038_s27 = smov (!%p445_p3, %s1691_s27), 47  ;;  %471 = sbr.rel (%p1699_p4) target bundleno = 26 (0x1a), region = 56 }
   0xf   : > { %s1692_s28 = sshll.u32 %s3038_s27, 3  ;;  %v2163_v0 = vmov (!%p1699_p4), 0.0  }
  0x10   : > { %s2248_s14 = scalar_lea.vmem %s3030_s0, %s1692_s28  ;;  %s2253_s17 = scalar_lea.vmem %s3015_s1, %s1692_s28  ;;  %472 = vst [vmem:[%s3024_s10] sm:$0xff] (!%p1699_p4), %v2163_v0  ;;  %473 = vst [vmem:[%s3024_s10 + $0x8] sm:$0xff] (!%p1699_p4), %v2163_v0 }
  0x11   : > { %s2258_s20 = scalar_lea.vmem %s3022_s8, %s1692_s28  ;;  %s2263_s23 = scalar_lea.vmem %s3023_s9, %s1692_s28  ;;  %474 = vst [vmem:[%s3024_s10 + $0x10] sm:$0xff] (!%p1699_p4), %v2163_v0  ;;  %475 = vst [vmem:[%s3024_s10 + $0x18] sm:$0xff] (!%p1699_p4), %v2163_v0 }
  0x12   : > { %476 = vst [vmem:[%s3024_s10 + $0x20] sm:$0xff] (!%p1699_p4), %v2163_v0  ;;  %477 = vst [vmem:[%s3024_s10 + $0x28] sm:$0xff] (!%p1699_p4), %v2163_v0 }
  0x13   : > { %478 = vst [vmem:[%s3024_s10 + $0x30] sm:$0xff] (!%p1699_p4), %v2163_v0  ;;  %479 = vst [vmem:[%s3024_s10 + $0x38] sm:$0xff] (!%p1699_p4), %v2163_v0 }
  0x14   : > { %480 = vst [vmem:[%s3024_s10 + $0x40] sm:$0xff] (!%p1699_p4), %v2163_v0  ;;  %481 = vst [vmem:[%s3024_s10 + $0x48] sm:$0xff] (!%p1699_p4), %v2163_v0 }
  0x15   : > { %482 = vst [vmem:[%s3024_s10 + $0x50] sm:$0xff] %v2163_v0  ;;  %483 = vst [vmem:[%s3024_s10 + $0x58] sm:$0xff] %v2163_v0 }
  0x16   : > { %484 = vst [vmem:[%s3024_s10 + $0x60] sm:$0xff] %v2163_v0  ;;  %485 = vst [vmem:[%s3024_s10 + $0x68] sm:$0xff] %v2163_v0 }
  0x17   : > { %486 = vst [vmem:[%s3024_s10 + $0x70] sm:$0xff] %v2163_v0  ;;  %487 = vst [vmem:[%s3024_s10 + $0x78] sm:$0xff] %v2163_v0 }
  0x18   : > { %488 = vst [vmem:[%s3025_s11] sm:$0x1] %v2163_v0  ;;  %489 = vst [vmem:[%s3026_s12] sm:$0x1] %v2163_v0 }
  0x19   : > { %490 = vst [vmem:[%s3027_s13] sm:$0x1] %v2163_v0 }
  0x1a PF: > { %v732_v1 = vld [vmem:[%s3018_s4] sm:$0xff]  ;;  %v733_v2 = vld [vmem:[%s3018_s4 + $0x8] sm:$0xff]  ;;  %v734_v3 = vld [vmem:[%s3018_s4 + $0x10] sm:$0xff]  ;;  %vm538_vm0 = vcmask 523264  }
  0x1b   : > { %v2066_v4 = vpack.c.bf16 %v733_v2, %v732_v1  ;;  %v735_v5 = vld [vmem:[%s3018_s4 + $0x18] sm:$0xff]  ;;  %v736_v7 = vld [vmem:[%s3018_s4 + $0x20] sm:$0xff]  ;;  %v737_v8 = vld [vmem:[%s3018_s4 + $0x28] sm:$0xff] }
  0x1c   : > { %v2070_v6 = vpack.c.bf16 %v735_v5, %v734_v3  ;;  %v2342_v9 = vld [vmem:[%s2253_s17] sm:$0xff]  ;;  %v2074_v10 = vpack.c.bf16 %v737_v8, %v736_v7  ;;  %v738_v11 = vld [vmem:[%s3018_s4 + $0x30] sm:$0xff]  ;;  %v739_v12 = vld [vmem:[%s3018_s4 + $0x38] sm:$0xff]  ;;  %v1101_v5 = vlaneseq }
  0x1d   : > { %2067 = vmatprep.subr.bf16.mxu1 %v2066_v4  ;;  %1930 = vmatprep.mubr.msk.f32.mxu1 %vm538_vm0, %v2342_v9  ;;  %v523_v13 = vld [vmem:[%s3016_s2] sm:$0xff]  ;;  %v524_v14 = vld [vmem:[%s3016_s2 + $0x8] sm:$0xff]  ;;  %v525_v15 = vld [vmem:[%s3016_s2 + $0x10] sm:$0xff]  ;;  %v2078_v16 = vpack.c.bf16 %v739_v12, %v738_v11 }
  0x1e   : > { %2069 = vmatpush3.bf16.msra.mxu1 %v2066_v4  ;;  %v2050_v17 = vpack.c.bf16 %v524_v14, %v523_v13  ;;  %v526_v18 = vld [vmem:[%s3016_s2 + $0x18] sm:$0xff]  ;;  %v527_v20 = vld [vmem:[%s3016_s2 + $0x20] sm:$0xff]  ;;  %v528_v21 = vld [vmem:[%s3016_s2 + $0x28] sm:$0xff] }
  0x1f   : > { %2071 = vmatprep.subr.bf16.mxu1 %v2070_v6  ;;  %v2054_v19 = vpack.c.bf16 %v526_v18, %v525_v15  ;;  %v491_v22 = vld [vmem:[%s2248_s14] sm:$0xff]  ;;  %v2058_v23 = vpack.c.bf16 %v528_v21, %v527_v20  ;;  %v529_v24 = vld [vmem:[%s3016_s2 + $0x30] sm:$0xff]  ;;  %v530_v25 = vld [vmem:[%s3016_s2 + $0x38] sm:$0xff] }
  0x20   : > { %2051 = vmatprep.subr.bf16.mxu0 %v2050_v17  ;;  %1890 = vmatprep.mubr.msk.f32.mxu0 %vm538_vm0, %v491_v22  ;;  %v2379_v26 = vld [vmem:[%s2253_s17 + $0x8] sm:$0xff]  ;;  %v2382_v27 = vld [vmem:[%s2253_s17 + $0x10] sm:$0xff]  ;;  %v2062_v28 = vpack.c.bf16 %v530_v25, %v529_v24  ;;  %v940_v29 = vld [vmem:[%s3020_s6] sm:$0xff] }
  0x21   : > { %2053 = vmatpush3.bf16.msra.mxu0 %v2050_v17  ;;  %v941_v30 = vld [vmem:[%s3020_s6 + $0x8] sm:$0xff]  ;;  %v2395_v31 = vld [vmem:[%s2253_s17 + $0x18] sm:$0xff]  ;;  %v2398_v32 = vld [vmem:[%s2253_s17 + $0x20] sm:$0xff] }
  0x22   : > { %2073 = vmatpush3.bf16.msra.mxu1 %v2070_v6  ;;  %2055 = vmatprep.subr.bf16.mxu0 %v2054_v19  ;;  %v2082_v33 = vpack.c.bf16 %v941_v30, %v940_v29  ;;  %v942_v34 = vld [vmem:[%s3020_s6 + $0x10] sm:$0xff]  ;;  %v943_v35 = vld [vmem:[%s3020_s6 + $0x18] sm:$0xff]  ;;  %v2411_v36 = vld [vmem:[%s2253_s17 + $0x28] sm:$0xff]  ;;  %v2507_v6 = vshrl.u32 %v1101_v5, 7 }
  0x23   : > { %2075 = vmatprep.subr.bf16.mxu1 %v2074_v10  ;;  %v492_v37 = vld [vmem:[%s2248_s14 + $0x8] sm:$0xff]  ;;  %v2415_v38 = vld [vmem:[%s2253_s17 + $0x30] sm:$0xff]  ;;  %v2086_v40 = vpack.c.bf16 %v943_v35, %v942_v34  ;;  %v944_v41 = vld [vmem:[%s3020_s6 + $0x20] sm:$0xff] }
  0x24   : > { %v493_v39 = vld [vmem:[%s2248_s14 + $0x10] sm:$0xff]  ;;  %v945_v42 = vld [vmem:[%s3020_s6 + $0x28] sm:$0xff]  ;;  %v2430_v43 = vld [vmem:[%s2253_s17 + $0x38] sm:$0xff]  ;;  %v1103_v7 = vadd.s32 8, %v2507_v6  ;;  %v1104_v8 = vadd.s32 16, %v2507_v6  ;;  %v1106_v11 = vadd.s32 32, %v2507_v6 }
  0x25   : > { %2057 = vmatpush3.bf16.msra.mxu0 %v2054_v19  ;;  %v494_v44 = vld [vmem:[%s2248_s14 + $0x18] sm:$0xff]  ;;  %v515_v45 = vld [vmem:[%s2253_s17 + $0x40] sm:$0xff]  ;;  %v2090_v47 = vpack.c.bf16 %v945_v42, %v944_v41  ;;  %v946_v48 = vld [vmem:[%s3020_s6 + $0x30] sm:$0xff]  ;;  %v1107_v12 = vadd.s32 40, %v2507_v6  ;;  %v1108_v20 = vadd.s32 48, %v2507_v6  ;;  %v1109_v21 = vadd.s32 56, %v2507_v6 }
  0x26   : > { %2077 = vmatpush3.bf16.msra.mxu1 %v2074_v10  ;;  %2059 = vmatprep.subr.bf16.mxu0 %v2058_v23  ;;  %v495_v46 = vld [vmem:[%s2248_s14 + $0x20] sm:$0xff]  ;;  %v947_v49 = vld [vmem:[%s3020_s6 + $0x38] sm:$0xff]  ;;  %v516_v50 = vld [vmem:[%s2253_s17 + $0x48] sm:$0xff]  ;;  %v1105_v10 = vadd.s32 24, %v2507_v6  ;;  %v1111_v22 = vadd.s32 72, %v2507_v6 }
  0x27   : > { %2079 = vmatprep.subr.bf16.mxu1 %v2078_v16  ;;  %v496_v51 = vld [vmem:[%s2248_s14 + $0x28] sm:$0xff]  ;;  %v517_v52 = vld [vmem:[%s2253_s17 + $0x50] sm:$0xff]  ;;  %v2094_v54 = vpack.c.bf16 %v947_v49, %v946_v48  ;;  %v518_v55 = vld [vmem:[%s2253_s17 + $0x58] sm:$0xff] }
  0x28   : > { %v497_v53 = vld [vmem:[%s2248_s14 + $0x30] sm:$0xff]  ;;  %v498_v56 = vld [vmem:[%s2248_s14 + $0x38] sm:$0xff]  ;;  %v519_v57 = vld [vmem:[%s2253_s17 + $0x60] sm:$0xff] }
  0x29   : > { %2061 = vmatpush3.bf16.msra.mxu0 %v2058_v23  ;;  %v499_v58 = vld [vmem:[%s2248_s14 + $0x40] sm:$0xff]  ;;  %v520_v59 = vld [vmem:[%s2253_s17 + $0x68] sm:$0xff]  ;;  %v521_v61 = vld [vmem:[%s2253_s17 + $0x70] sm:$0xff] }
  0x2a   : > { %2081 = vmatpush3.bf16.msra.mxu1 %v2078_v16  ;;  %2063 = vmatprep.subr.bf16.mxu0 %v2062_v28  ;;  %v500_v60 = vld [vmem:[%s2248_s14 + $0x48] sm:$0xff]  ;;  %v501_v62 = vld [vmem:[%s2248_s14 + $0x50] sm:$0xff]  ;;  %v522_v63 = vld [vmem:[%s2253_s17 + $0x78] sm:$0xff] }
  0x2b   : > { %v502_v0 = vld [vmem:[%s2248_s14 + $0x58] sm:$0xff]  ;;  %v503_v1 = vld [vmem:[%s2248_s14 + $0x60] sm:$0xff]  ;;  %v504_v2 = vld [vmem:[%s2248_s14 + $0x68] sm:$0xff] }
  0x2c   : > { %v505_v3 = vld [vmem:[%s2248_s14 + $0x70] sm:$0xff]  ;;  %v506_v4 = vld [vmem:[%s2248_s14 + $0x78] sm:$0xff]  ;;  %s1751_s14 = sshll.u32 %s2240_s26, 7  ;;  %v2536_v18 = vld [vmem:[%s3019_s5] ss:$0 sm:$0xff] }
  0x2d   : > { %1931 = vmatmul.mubr.msk.f32.vlgmr.msra.gmra.mrb[0].mxu1 %vm538_vm0, %v2379_v26  ;;  %2065 = vmatpush3.bf16.msra.mxu0 %v2062_v28 }
  0x2e   : > { %1933 = vmatprep.mubr.msk.f32.mxu1 %vm538_vm0, %v2382_v27  ;;  %2083 = vmatprep.subr.bf16.mxu0 %v2082_v33 }
  0x30   : > { %1891 = vmatmul.mubr.msk.f32.vlgmr.msra.gmra.mrb[0].mxu0 %vm538_vm0, %v492_v37  ;;  %v1114_v37 = vadd.s32 96, %v2507_v6 }
  0x31   : > { %1934 = vmatmul.mubr.msk.f32.gmra.mrb[2].mxu1 %vm538_vm0, %v2395_v31  ;;  %1893 = vmatprep.mubr.msk.f32.mxu0 %vm538_vm0, %v493_v39 }
  0x32   : > { %1936 = vmatprep.mubr.msk.f32.mxu1 %vm538_vm0, %v2398_v32  ;;  %2085 = vmatpush3.bf16.msra.mxu0 %v2082_v33  ;;  %v1113_v33 = vadd.s32 88, %v2507_v6 }
  0x33   : > { %2087 = vmatprep.subr.bf16.mxu0 %v2086_v40 }
  0x34   : > { %1894 = vmatmul.mubr.msk.f32.gmra.mrb[2].mxu0 %vm538_vm0, %v494_v44 }
  0x35   : > { %1937 = vmatmul.mubr.msk.f32.gmra.mrb[4].mxu1 %vm538_vm0, %v2411_v36  ;;  %1896 = vmatprep.mubr.msk.f32.mxu0 %vm538_vm0, %v495_v46  ;;  %v2581_v46 = vld [vmem:[%s3017_s3] ss:$0 sm:$0xff] }
  0x36   : > { %1939 = vmatprep.mubr.msk.f32.mxu1 %vm538_vm0, %v2415_v38  ;;  %2089 = vmatpush3.bf16.msra.mxu0 %v2086_v40 }
  0x37   : > { %2091 = vmatprep.subr.bf16.mxu0 %v2090_v47 }
  0x38   : > { %1897 = vmatmul.mubr.msk.f32.gmra.mrb[4].mxu0 %vm538_vm0, %v496_v51 }
  0x39   : > { %1940 = vmatmul.mubr.msk.f32.gmra.mrb[6].mxu1 %vm538_vm0, %v2430_v43  ;;  %1899 = vmatprep.mubr.msk.f32.mxu0 %vm538_vm0, %v497_v53 }
  0x3a   : > { %1942 = vmatprep.mubr.msk.f32.mxu1 %vm538_vm0, %v515_v45  ;;  %2093 = vmatpush3.bf16.msra.mxu0 %v2090_v47 }
  0x3b   : > { %2095 = vmatprep.subr.bf16.mxu0 %v2094_v54 }
  0x3c   : > { %1900 = vmatmul.mubr.msk.f32.gmra.mrb[6].mxu0 %vm538_vm0, %v498_v56 }
  0x3d   : > { %1943 = vmatmul.mubr.msk.f32.gmra.mrb[8].mxu1 %vm538_vm0, %v516_v50  ;;  %1902 = vmatprep.mubr.msk.f32.mxu0 %vm538_vm0, %v499_v58 }
  0x3e   : > { %1945 = vmatprep.mubr.msk.f32.mxu1 %vm538_vm0, %v517_v52  ;;  %2097 = vmatpush3.bf16.msra.mxu0 %v2094_v54 }
  0x40   : > { %1903 = vmatmul.mubr.msk.f32.gmra.mrb[8].mxu0 %vm538_vm0, %v500_v60 }
  0x41   : > { %1946 = vmatmul.mubr.msk.f32.gmra.mrb[10].mxu1 %vm538_vm0, %v518_v55  ;;  %1905 = vmatprep.mubr.msk.f32.mxu0 %vm538_vm0, %v501_v62 }
  0x42   : > { %1948 = vmatprep.mubr.msk.f32.mxu1 %vm538_vm0, %v519_v57 }
  0x44   : > { %1906 = vmatmul.mubr.msk.f32.gmra.mrb[10].mxu0 %vm538_vm0, %v502_v0 }
  0x45   : > { %1949 = vmatmul.mubr.msk.f32.gmra.mrb[12].mxu1 %vm538_vm0, %v520_v59  ;;  %1908 = vmatprep.mubr.msk.f32.mxu0 %vm538_vm0, %v503_v1  ;;  %v1117_v1 = vadd.s32 120, %v2507_v6 }
  0x46   : > { %1951 = vmatprep.mubr.msk.f32.mxu1 %vm538_vm0, %v521_v61 }
  0x48   : > { %1909 = vmatmul.mubr.msk.f32.gmra.mrb[12].mxu0 %vm538_vm0, %v504_v2 }
  0x49   : > { %1952 = vmatmul.mubr.msk.f32.gmra.mrb[14].mxu1 %vm538_vm0, %v522_v63  ;;  %1911 = vmatprep.mubr.msk.f32.mxu0 %vm538_vm0, %v505_v3 }
  0x4c   : > { %1912 = vmatmul.mubr.msk.f32.gmra.mrb[14].mxu0 %vm538_vm0, %v506_v4 }
  0x4d   : > { %1970 = vmatprep.mubr.msk.f32.mxu0 %vm538_vm0, %v2342_v9  ;;  %v2512_v9 = vstv %s1751_s14 }
  0x4e   : > { %v2519_v13 = vadd.s32 %v2512_v9, %v2507_v6  ;;  %v2522_v14 = vadd.s32 %v2512_v9, %v1103_v7  ;;  %v2525_v15 = vadd.s32 %v2512_v9, %v1104_v8  ;;  %v2528_v16 = vadd.s32 %v2512_v9, %v1105_v10 }
  0x4f   : > { %v2531_v17 = vadd.s32 %v2512_v9, %v1106_v11  ;;  %v2539_v19 = vadd.s32 %v2512_v9, %v1107_v12  ;;  %v2554_v28 = vadd.s32 %v2512_v9, %v1108_v20  ;;  %v2557_v29 = vadd.s32 %v2512_v9, %v1109_v21 }
  0x50   : > { %1971 = vmatmul.mubr.msk.f32.vlgmr.msra.gmra.mrb[16].mxu0 %vm538_vm0, %v2379_v26  ;;  %vm1135_vm1 = vcmp.lt.s32.totalorder %v2519_v13, 300  ;;  %vm1136_vm2 = vcmp.lt.s32.totalorder %v2522_v14, 300  ;;  %vm1137_vm3 = vcmp.lt.s32.totalorder %v2525_v15, 300  ;;  %vm1138_vm4 = vcmp.lt.s32.totalorder %v2528_v16, 300  ;;  %v1456_v14 = vld [vmem:[%s3025_s11] sm:$0x1] }
  0x51   : > { %1973 = vmatprep.mubr.msk.f32.mxu0 %vm538_vm0, %v2382_v27  ;;  %vm1139_vm5 = vcmp.lt.s32.totalorder %v2531_v17, 300  ;;  %v1110_v26 = vadd.s32 64, %v2507_v6  ;;  %vm1140_vm6 = vcmp.lt.s32.totalorder %v2539_v19, 300  ;;  %vm1141_vm7 = vcmp.lt.s32.totalorder %v2554_v28, 300 }
  0x52   : > { %vm1142_vm8 = vcmp.lt.s32.totalorder %v2557_v29, 300  ;;  %v2595_v54 = vadd.s32 %v2512_v9, %v1114_v37  ;;  %v2635_v37 = vadd.s32 %v2512_v9, %v1117_v1 }
  0x54   : > { %1974 = vmatmul.mubr.msk.f32.gmra.mrb[18].mxu0 %vm538_vm0, %v2395_v31  ;;  %v2562_v31 = vadd.s32 %v2512_v9, %v1111_v22  ;;  %vm1147_vm14 = vcmp.lt.s32.totalorder %v2595_v54, 300  ;;  %vm1150_vm15 = vcmp.lt.s32.totalorder %v2635_v37, 300 }
  0x55   : > { %1976 = vmatprep.mubr.msk.f32.mxu0 %vm538_vm0, %v2398_v32  ;;  %v1112_v32 = vadd.s32 80, %v2507_v6 }
  0x56   : > { %vm1144_vm9 = vcmp.lt.s32.totalorder %v2562_v31, 300  ;;  %v1480_v31 = vld [vmem:[%s3026_s12] sm:$0x1] }
  0x57   : > { %v2586_v49 = vadd.s32 %v2512_v9, %v1112_v32 }
  0x58   : > { %1977 = vmatmul.mubr.msk.f32.gmra.mrb[20].mxu0 %vm538_vm0, %v2411_v36 }
  0x59   : > { %1979 = vmatprep.mubr.msk.f32.mxu0 %vm538_vm0, %v2415_v38  ;;  %v1115_v38 = vadd.s32 104, %v2507_v6  ;;  %vm1145_vm12 = vcmp.lt.s32.totalorder %v2586_v49, 300 }
  0x5c   : > { %1980 = vmatmul.mubr.msk.f32.gmra.mrb[22].mxu0 %vm538_vm0, %v2430_v43  ;;  %v2572_v43 = vadd.s32 %v2512_v9, %v1110_v26 }
  0x5d   : > { %1982 = vmatprep.mubr.msk.f32.mxu0 %vm538_vm0, %v515_v45  ;;  %v1116_v45 = vadd.s32 112, %v2507_v6 }
  0x5e   : > { %vm1143_vm10 = vcmp.lt.s32.totalorder %v2572_v43, 300 }
  0x5f   : > { %v2605_v0 = vadd.s32 %v2512_v9, %v1116_v45 }
  0x60   : > { %1983 = vmatmul.mubr.msk.f32.gmra.mrb[24].mxu0 %vm538_vm0, %v516_v50  ;;  %v2589_v50 = vadd.s32 %v2512_v9, %v1113_v33 }
  0x61   : > { %1985 = vmatprep.mubr.msk.f32.mxu0 %vm538_vm0, %v517_v52 }
  0x62   : > { %vm1146_vm11 = vcmp.lt.s32.totalorder %v2589_v50, 300 }
  0x64   : > { %1986 = vmatmul.mubr.msk.f32.gmra.mrb[26].mxu0 %vm538_vm0, %v518_v55  ;;  %v2598_v55 = vadd.s32 %v2512_v9, %v1115_v38 }
  0x65   : > { %1988 = vmatprep.mubr.msk.f32.mxu0 %vm538_vm0, %v519_v57 }
  0x66   : > { %vm1148_vm13 = vcmp.lt.s32.totalorder %v2598_v55, 300 }
  0x68   : > { %1989 = vmatmul.mubr.msk.f32.gmra.mrb[28].mxu0 %vm538_vm0, %v520_v59 }
  0x69   : > { %1991 = vmatprep.mubr.msk.f32.mxu0 %vm538_vm0, %v521_v61 }
  0x6c   : > { %1992 = vmatmul.mubr.msk.f32.gmra.mrb[30].mxu0 %vm538_vm0, %v522_v63  ;;  %vm3028_vm0 = vcmp.lt.s32.totalorder %v2605_v0, 300 }
 0x100   : > { %v1932_v23 = vpop.f32.mrb[0].mxu1 }
 0x101   : > { %v867_v24 = vadd.f32 %v1932_v23, %v2536_v18  ;;  %v861_v25 = vpop.f32.mrb[1].mxu1 }
 0x102   : > { %v862_v27 = vadd.f32 %v2536_v18, %v861_v25 }
 0x103   : > { %v1168_v30 = vsel %vm1136_vm2, %v867_v24, 0.0  ;;  %v1892_v56 = vpop.f32.mrb[0].mxu0 }
 0x104   : > { %v1935_v34 = vpop.f32.mrb[2].mxu1  ;;  %v1167_v35 = vsel %vm1135_vm1, %v862_v27, 0.0  ;;  %v1522_v36 = vmul.f32 %v1168_v30, %v1168_v30  ;;  %v659_v61 = vadd.f32 %v1892_v56, %v2581_v46  ;;  %v653_v62 = vpop.f32.mrb[1].mxu0 }
 0x105   : > { %v877_v39 = vadd.f32 %v1935_v34, %v2536_v18  ;;  %v871_v40 = vpop.f32.mrb[3].mxu1  ;;  %1247 = vxpose.xlu0.b32.start [1/16] %v1167_v35, 128  ;;  %v1521_v41 = vmul.f32 %v1167_v35, %v1167_v35  ;;  %v1457_v42 = vadd.f32 %v1168_v30, %v1167_v35  ;;  %v654_v2 = vadd.f32 %v2581_v46, %v653_v62 }
 0x106   : > { %v872_v44 = vadd.f32 %v2536_v18, %v871_v40  ;;  %v1152_v7 = vsel %vm1136_vm2, %v659_v61, 0.0 }
 0x107   : > { %v1537_v47 = vadd.f32 %v1522_v36, %v1521_v41  ;;  %v1170_v48 = vsel %vm1138_vm4, %v877_v39, 0.0  ;;  %1200 = vst [vmem:[%s2258_s20 + $0x8] sm:$0xff] %v1152_v7  ;;  %v1482_v6 = vmul.f32 %v1152_v7, %v1152_v7  ;;  %v1151_v12 = vsel %vm1135_vm1, %v654_v2, 0.0  ;;  %v1895_v20 = vpop.f32.mrb[2].mxu0 }
 0x108   : > { %v1938_v51 = vpop.f32.mrb[4].mxu1  ;;  %v1169_v52 = vsel %vm1137_vm3, %v872_v44, 0.0  ;;  %v1524_v53 = vmul.f32 %v1170_v48, %v1170_v48  ;;  %1199 = vst [vmem:[%s2258_s20] sm:$0xff] %v1151_v12  ;;  %v663_v26 = vpop.f32.mrb[3].mxu0  ;;  %v669_v32 = vadd.f32 %v1895_v20, %v2581_v46 }
 0x109   : > { %v887_v57 = vadd.f32 %v1938_v51, %v2536_v18  ;;  %v881_v58 = vpop.f32.mrb[5].mxu1  ;;  %1248 = vxpose.xlu0.b32.cont [2/16] %v1168_v30, 128  ;;  %v1458_v59 = vadd.f32 %v1457_v42, %v1169_v52  ;;  %v1523_v60 = vmul.f32 %v1169_v52, %v1169_v52  ;;  %v1481_v30 = vmul.f32 %v1151_v12, %v1151_v12 }
 0x10a   : > { %v882_v63 = vadd.f32 %v2536_v18, %v881_v58  ;;  %v664_v33 = vadd.f32 %v2581_v46, %v663_v26  ;;  %v1154_v42 = vsel %vm1138_vm4, %v669_v32, 0.0 }
 0x10b   : > { %v1538_v3 = vadd.f32 %v1537_v47, %v1523_v60  ;;  %v1459_v4 = vadd.f32 %v1458_v59, %v1170_v48  ;;  %v2611_v5 = vsel %vm1140_vm6, %v887_v57, 0.0  ;;  %v1497_v41 = vadd.f32 %v1482_v6, %v1481_v30  ;;  %v1898_v44 = vpop.f32.mrb[4].mxu0  ;;  %1202 = vst [vmem:[%s2258_s20 + $0x18] sm:$0xff] %v1154_v42 }
 0x10c   : > { %v1941_v8 = vpop.f32.mrb[6].mxu1  ;;  %v1171_v10 = vsel %vm1139_vm5, %v882_v63, 0.0  ;;  %v1526_v11 = vmul.f32 %v2611_v5, %v2611_v5  ;;  %v1484_v57 = vmul.f32 %v1154_v42, %v1154_v42  ;;  %v1153_v58 = vsel %vm1137_vm3, %v664_v33, 0.0 }
 0x10d   : > { %v897_v21 = vadd.f32 %v1941_v8, %v2536_v18  ;;  %v891_v22 = vpop.f32.mrb[7].mxu1  ;;  %1249 = vxpose.xlu0.b32.cont [3/16] %v1169_v52, 128  ;;  %v1539_v23 = vadd.f32 %v1538_v3, %v1524_v53  ;;  %v1460_v24 = vadd.f32 %v1459_v4, %v1171_v10  ;;  %v1525_v25 = vmul.f32 %v1171_v10, %v1171_v10  ;;  %v673_v53 = vpop.f32.mrb[5].mxu0 }
 0x10e   : > { %v892_v27 = vadd.f32 %v2536_v18, %v891_v22  ;;  %v679_v59 = vadd.f32 %v1898_v44, %v2581_v46  ;;  %1201 = vst [vmem:[%s2258_s20 + $0x10] sm:$0xff] %v1153_v58  ;;  %v1483_v62 = vmul.f32 %v1153_v58, %v1153_v58  ;;  %v674_v4 = vadd.f32 %v2581_v46, %v673_v53 }
 0x10f   : > { %v1540_v34 = vadd.f32 %v1539_v23, %v1525_v25  ;;  %v1461_v35 = vadd.f32 %v1460_v24, %v2611_v5  ;;  %v2632_v36 = vsel %vm1142_vm8, %v897_v21, 0.0  ;;  %v1901_v7 = vpop.f32.mrb[6].mxu0 }
 0x110   : > { %v1944_v38 = vpop.f32.mrb[8].mxu1  ;;  %v2639_v39 = vsel %vm1141_vm7, %v892_v27, 0.0  ;;  %v1528_v40 = vmul.f32 %v2632_v36, %v2632_v36  ;;  %v1156_v3 = vsel %vm1140_vm6, %v679_v59, 0.0  ;;  %v683_v21 = vpop.f32.mrb[7].mxu0  ;;  %v1498_v23 = vadd.f32 %v1497_v41, %v1483_v62 }
 0x111   : > { %v907_v45 = vadd.f32 %v1944_v38, %v2536_v18  ;;  %v901_v9 = vpop.f32.mrb[9].mxu1  ;;  %1250 = vxpose.xlu0.b32.cont [4/16] %v1170_v48, 128  ;;  %v1541_v47 = vadd.f32 %v1540_v34, %v1526_v11  ;;  %v1462_v51 = vadd.f32 %v1461_v35, %v2639_v39  ;;  %v1527_v52 = vmul.f32 %v2639_v39, %v2639_v39 }
 0x112   : > { %v902_v56 = vadd.f32 %v2536_v18, %v901_v9  ;;  %1204 = vst [vmem:[%s2258_s20 + $0x28] sm:$0xff] %v1156_v3  ;;  %v1486_v24 = vmul.f32 %v1156_v3, %v1156_v3  ;;  %v1155_v25 = vsel %vm1139_vm5, %v674_v4, 0.0  ;;  %v1499_v35 = vadd.f32 %v1498_v23, %v1484_v57 }
 0x113   : > { %v1542_v60 = vadd.f32 %v1541_v47, %v1527_v52  ;;  %v1463_v48 = vadd.f32 %v1462_v51, %v2632_v36  ;;  %v2659_v61 = vsel %vm1144_vm9, %v907_v45, 0.0  ;;  %1203 = vst [vmem:[%s2258_s20 + $0x20] sm:$0xff] %v1155_v25  ;;  %v1485_v30 = vmul.f32 %v1155_v25, %v1155_v25 }
 0x114   : > { %v1947_v63 = vpop.f32.mrb[10].mxu1  ;;  %v2664_v1 = vsel %vm1143_vm10, %v902_v56, 0.0  ;;  %v1530_v2 = vmul.f32 %v2659_v61, %v2659_v61  ;;  %v689_v38 = vadd.f32 %v1901_v7, %v2581_v46  ;;  %v684_v56 = vadd.f32 %v2581_v46, %v683_v21 }
 0x115   : > { %v917_v8 = vadd.f32 %v1947_v63, %v2536_v18  ;;  %v911_v11 = vpop.f32.mrb[11].mxu1  ;;  %1251 = vxpose.xlu0.b32.cont [5/16] %v1171_v10, 128  ;;  %v1543_v6 = vadd.f32 %v1542_v60, %v1528_v40  ;;  %v1464_v12 = vadd.f32 %v1463_v48, %v2664_v1  ;;  %v1529_v20 = vmul.f32 %v2664_v1, %v2664_v1  ;;  %v1904_v40 = vpop.f32.mrb[8].mxu0 }
 0x116   : > { %v912_v22 = vadd.f32 %v2536_v18, %v911_v11  ;;  %v693_v47 = vpop.f32.mrb[9].mxu0  ;;  %v1500_v52 = vadd.f32 %v1499_v35, %v1485_v30  ;;  %v1158_v53 = vsel %vm1142_vm8, %v689_v38, 0.0  ;;  %v1157_v63 = vsel %vm1141_vm7, %v684_v56, 0.0 }
 0x117   : > { %v1544_v26 = vadd.f32 %v1543_v6, %v1529_v20  ;;  %v1465_v10 = vadd.f32 %v1464_v12, %v2659_v61  ;;  %v2684_v27 = vsel %vm1146_vm11, %v917_v8, 0.0  ;;  %1206 = vst [vmem:[%s2258_s20 + $0x38] sm:$0xff] %v1158_v53  ;;  %v1488_v59 = vmul.f32 %v1158_v53, %v1158_v53  ;;  %v1907_v3 = vpop.f32.mrb[10].mxu0  ;;  %1205 = vst [vmem:[%s2258_s20 + $0x30] sm:$0xff] %v1157_v63 }
 0x118   : > { %v1950_v32 = vpop.f32.mrb[12].mxu1  ;;  %v2689_v33 = vsel %vm1145_vm12, %v912_v22, 0.0  ;;  %v1532_v34 = vmul.f32 %v2684_v27, %v2684_v27  ;;  %v703_v12 = vpop.f32.mrb[11].mxu0  ;;  %v1487_v21 = vmul.f32 %v1157_v63, %v1157_v63  ;;  %v699_v22 = vadd.f32 %v1904_v40, %v2581_v46 }
 0x119   : > { %v927_v41 = vadd.f32 %v1950_v32, %v2536_v18  ;;  %v921_v42 = vpop.f32.mrb[13].mxu1  ;;  %1252 = vxpose.xlu0.b32.cont [6/16] %v2611_v5, 128  ;;  %v1545_v44 = vadd.f32 %v1544_v26, %v1530_v2  ;;  %v1466_v45 = vadd.f32 %v1465_v10, %v2689_v33  ;;  %v1531_v9 = vmul.f32 %v2689_v33, %v2689_v33 }
 0x11a   : > { %v922_v51 = vadd.f32 %v2536_v18, %v921_v42  ;;  %v1501_v2 = vadd.f32 %v1500_v52, %v1486_v24  ;;  %v694_v23 = vadd.f32 %v2581_v46, %v693_v47  ;;  %v709_v26 = vadd.f32 %v1907_v3, %v2581_v46 }
 0x11b   : > { %v1546_v57 = vadd.f32 %v1545_v44, %v1531_v9  ;;  %v1467_v58 = vadd.f32 %v1466_v45, %v2684_v27  ;;  %v2706_v5 = vsel %vm1148_vm13, %v927_v41, 0.0  ;;  %v1160_v30 = vsel %vm1144_vm9, %v699_v22, 0.0  ;;  %v1910_v32 = vpop.f32.mrb[12].mxu0 }
 0x11c   : > { %v1953_v60 = vpop.f32.mrb[14].mxu1  ;;  %v2711_v48 = vsel %vm1147_vm14, %v922_v51, 0.0  ;;  %v1534_v62 = vmul.f32 %v2706_v5, %v2706_v5  ;;  %1208 = vst [vmem:[%s2258_s20 + $0x48] sm:$0xff] %v1160_v30  ;;  %v713_v41 = vpop.f32.mrb[13].mxu0  ;;  %v1159_v42 = vsel %vm1143_vm10, %v694_v23, 0.0  ;;  %v1162_v45 = vsel %vm1146_vm11, %v709_v26, 0.0 }
 0x11d   : > { %v937_v4 = vadd.f32 %v1953_v60, %v2536_v18  ;;  %v931_v7 = vpop.f32.mrb[15].mxu1  ;;  %1253 = vxpose.xlu0.b32.cont [7/16] %v2639_v39, 128  ;;  %v1547_v8 = vadd.f32 %v1546_v57, %v1532_v34  ;;  %v1468_v11 = vadd.f32 %v1467_v58, %v2711_v48  ;;  %v1533_v6 = vmul.f32 %v2711_v48, %v2711_v48 }
 0x11e   : > { %v932_v20 = vadd.f32 %v2536_v18, %v931_v7  ;;  %v1502_v18 = vadd.f32 %v1501_v2, %v1487_v21  ;;  %v1490_v51 = vmul.f32 %v1160_v30, %v1160_v30  ;;  %1207 = vst [vmem:[%s2258_s20 + $0x40] sm:$0xff] %v1159_v42  ;;  %v1489_v52 = vmul.f32 %v1159_v42, %v1159_v42 }
 0x11f   : > { %v1548_v24 = vadd.f32 %v1547_v8, %v1533_v6  ;;  %v1469_v25 = vadd.f32 %v1468_v11, %v2706_v5  ;;  %v2729_v39 = vsel %vm1150_vm15, %v937_v4, 0.0  ;;  %1210 = vst [vmem:[%s2258_s20 + $0x58] sm:$0xff] %v1162_v45  ;;  %v719_v56 = vadd.f32 %v1910_v32, %v2581_v46  ;;  %v1913_v58 = vpop.f32.mrb[14].mxu0 }
 0x120   : > { %v2734_v10 = vsel %vm3028_vm0, %v932_v20, 0.0  ;;  %v1536_v40 = vmul.f32 %v2729_v39, %v2729_v39  ;;  %v1503_v44 = vadd.f32 %v1502_v18, %v1488_v59  ;;  %v714_v57 = vadd.f32 %v2581_v46, %v713_v41  ;;  %v723_v2 = vpop.f32.mrb[15].mxu0  ;;  %v2770_v20 = vld [vmem:[%s3021_s7] ss:$0 sm:$0xff] }
 0x121   : > { %1254 = vxpose.xlu0.b32.cont [8/16] %v2632_v36, 128  ;;  %v1549_v34 = vadd.f32 %v1548_v24, %v1534_v62  ;;  %v1470_v35 = vadd.f32 %v1469_v25, %v2734_v10  ;;  %v1535_v38 = vmul.f32 %v2734_v10, %v2734_v10  ;;  %v704_v36 = vadd.f32 %v2581_v46, %v703_v12 }
 0x122   : > { %v1504_v62 = vadd.f32 %v1503_v44, %v1489_v52  ;;  %v1164_v3 = vsel %vm1148_vm13, %v719_v56, 0.0  ;;  %v1163_v4 = vsel %vm1147_vm14, %v714_v57, 0.0  ;;  %v729_v7 = vadd.f32 %v1913_v58, %v2581_v46 }
 0x123   : > { %v1550_v9 = vadd.f32 %v1549_v34, %v1535_v38  ;;  %v1471_v47 = vadd.f32 %v1470_v35, %v2729_v39  ;;  %v1161_v53 = vsel %vm1145_vm12, %v704_v36, 0.0  ;;  %v724_v8 = vadd.f32 %v2581_v46, %v723_v2  ;;  %1212 = vst [vmem:[%s2258_s20 + $0x68] sm:$0xff] %v1164_v3  ;;  %1211 = vst [vmem:[%s2258_s20 + $0x60] sm:$0xff] %v1163_v4  ;;  %v1972_v46 = vpop.f32.mrb[16].mxu0 }
 0x124   : > { %1209 = vst [vmem:[%s2258_s20 + $0x50] sm:$0xff] %v1161_v53  ;;  %v1491_v63 = vmul.f32 %v1161_v53, %v1161_v53  ;;  %v1492_v6 = vmul.f32 %v1162_v45, %v1162_v45  ;;  %v1505_v12 = vadd.f32 %v1504_v62, %v1490_v51  ;;  %v1166_v21 = vsel %vm1150_vm15, %v729_v7, 0.0  ;;  %v1021_v18 = vpop.f32.mrb[17].mxu0  ;;  %v1520_v62 = vld [vmem:[%s3027_s13] sm:$0x1] }
 0x125   : > { %1255 = vxpose.xlu0.b32.cont [9/16] %v2664_v1, 128  ;;  %v1472_v59 = vrot.slane %v1471_v47, 4  ;;  %v1551_v60 = vadd.f32 %v1550_v9, %v1536_v40  ;;  %v1165_v22 = vsel %vm3028_vm0, %v724_v8, 0.0  ;;  %v1493_v26 = vmul.f32 %v1163_v4, %v1163_v4  ;;  %1214 = vst [vmem:[%s2258_s20 + $0x78] sm:$0xff] %v1166_v21  ;;  %vm2785_vm0 = vmpackc.low %vm1136_vm2, %vm1135_vm1 }
 0x126   : > { %v1506_v25 = vadd.f32 %v1505_v12, %v1491_v63  ;;  %1213 = vst [vmem:[%s2258_s20 + $0x70] sm:$0xff] %v1165_v22  ;;  %v1027_v30 = vadd.f32 %v1972_v46, %v2770_v20  ;;  %v1022_v32 = vadd.f32 %v2770_v20, %v1021_v18  ;;  %v1494_v38 = vmul.f32 %v1164_v3, %v1164_v3 }
 0x127   : > { %v1473_v11 = vadd.f32 %v1472_v59, %v1471_v47  ;;  %v1552_v1 = vrot.slane %v1551_v60, 4  ;;  %v1495_v41 = vmul.f32 %v1165_v22, %v1165_v22  ;;  %v1975_v36 = vpop.f32.mrb[18].mxu0  ;;  %v1496_v56 = vmul.f32 %v1166_v21, %v1166_v21 }
 0x128   : > { %v1507_v40 = vadd.f32 %v1506_v25, %v1492_v6  ;;  %v1184_v42 = vsel %vm1136_vm2, %v1027_v30, 0.0  ;;  %v1183_v44 = vsel %vm1135_vm1, %v1022_v32, 0.0  ;;  %v2098_v45 = vpack.c.bf16 %v1027_v30, %v1022_v32  ;;  %v1031_v53 = vpop.f32.mrb[19].mxu0  ;;  %vm2811_vm1 = vmpackc.low %vm1138_vm4, %vm1137_vm3 }
 0x129   : > { %1256 = vxpose.xlu0.b32.cont [10/16] %v2659_v61, 128  ;;  %v1474_v23 = vrot.slane %v1473_v11, 2  ;;  %v1553_v24 = vadd.f32 %v1552_v1, %v1551_v60  ;;  %1216 = vst [vmem:[%s2263_s23 + $0x8] sm:$0xff] %v1184_v42  ;;  %1215 = vst [vmem:[%s2263_s23] sm:$0xff] %v1183_v44  ;;  %v1037_v52 = vadd.f32 %v1975_v36, %v2770_v20 }
 0x12a   : > { %v1508_v51 = vadd.f32 %v1507_v40, %v1493_v26  ;;  %v1032_v13 = vadd.f32 %v2770_v20, %v1031_v53  ;;  %2100 = vmatprep.subr.msk.bf16.mxu1 %vm2785_vm0, %v2098_v45  ;;  %vm2111_vm2 = vmpackc.low %vm1140_vm6, %vm1139_vm5 }
 0x12b   : > { %v1475_v34 = vadd.f32 %v1474_v23, %v1473_v11  ;;  %v1554_v35 = vrot.slane %v1553_v24, 2  ;;  %v1186_v59 = vsel %vm1138_vm4, %v1037_v52, 0.0  ;;  %2103 = vmatpush3.bf16.msk.msra.mxu1 %vm2785_vm0, %v2098_v45  ;;  %v1978_v3 = vpop.f32.mrb[20].mxu0  ;;  %vm2123_vm4 = vmpackc.low %vm1144_vm9, %vm1143_vm10 }
 0x12c   : > { %v1509_v58 = vadd.f32 %v1508_v51, %v1494_v38  ;;  %1218 = vst [vmem:[%s2263_s23 + $0x18] sm:$0xff] %v1186_v59  ;;  %v1185_v63 = vsel %vm1137_vm3, %v1032_v13, 0.0  ;;  %v2104_v2 = vpack.c.bf16 %v1037_v52, %v1032_v13  ;;  %v1047_v8 = vadd.f32 %v1978_v3, %v2770_v20  ;;  %v1041_v11 = vpop.f32.mrb[21].mxu0  ;;  %vm2117_vm3 = vmpackc.low %vm1142_vm8, %vm1141_vm7 }
 0x12d   : > { %1257 = vxpose.xlu0.b32.cont [11/16] %v2689_v33, 128  ;;  %v1476_v9 = vrot.slane %v1475_v34, 1  ;;  %v1555_v47 = vadd.f32 %v1554_v35, %v1553_v24  ;;  %1217 = vst [vmem:[%s2263_s23 + $0x10] sm:$0xff] %v1185_v63  ;;  %v1042_v1 = vadd.f32 %v2770_v20, %v1041_v11 }
 0x12e   : > { %v1510_v16 = vadd.f32 %v1509_v58, %v1495_v41  ;;  %2106 = vmatprep.subr.msk.bf16.mxu1 %vm2811_vm1, %v2104_v2 }
 0x12f   : > { %v1477_v33 = vadd.f32 %v1476_v9, %v1475_v34  ;;  %v1556_v57 = vrot.slane %v1555_v47, 1  ;;  %2109 = vmatpush3.bf16.msk.msra.mxu1 %vm2811_vm1, %v2104_v2  ;;  %v1187_v12 = vsel %vm1139_vm5, %v1042_v1, 0.0  ;;  %v2110_v21 = vpack.c.bf16 %v1047_v8, %v1042_v1  ;;  %v1981_v22 = vpop.f32.mrb[22].mxu0  ;;  %vm2129_vm5 = vmpackc.low %vm1146_vm11, %vm1145_vm12 }
 0x130   : > { %v1511_v6 = vadd.f32 %v1510_v16, %v1496_v56  ;;  %1219 = vst [vmem:[%s2263_s23 + $0x20] sm:$0xff] %v1187_v12  ;;  %v1057_v23 = vadd.f32 %v1981_v22, %v2770_v20  ;;  %v1051_v19 = vpop.f32.mrb[23].mxu0 }
 0x131   : > { %1258 = vxpose.xlu0.b32.cont [12/16] %v2684_v27, 128  ;;  %v1478_v4 = vadd.f32 %v1477_v33, %v1456_v14  ;;  %v1557_v7 = vadd.f32 %v1556_v57, %v1555_v47  ;;  %v1188_v27 = vsel %vm1140_vm6, %v1047_v8, 0.0  ;;  %v1052_v24 = vadd.f32 %v2770_v20, %v1051_v19  ;;  %2112 = vmatprep.subr.msk.bf16.mxu1 %vm2111_vm2, %v2110_v21  ;;  %vm2135_vm6 = vmpackc.low %vm1148_vm13, %vm1147_vm14 }
 0x132   : > { %1220 = vst [vmem:[%s2263_s23 + $0x28] sm:$0xff] %v1188_v27  ;;  %v1512_v46 = vrot.slane %v1511_v6, 4  ;;  %v1190_v25 = vsel %vm1142_vm8, %v1057_v23, 0.0 }
 0x133   : > { %1479 = vst [vmem:[%s3025_s11] sm:$0x1] %v1478_v4  ;;  %v1558_v15 = vadd.f32 %v1557_v7, %v1520_v62  ;;  %2115 = vmatpush3.bf16.msk.msra.mxu1 %vm2111_vm2, %v2110_v21  ;;  %1222 = vst [vmem:[%s2263_s23 + $0x38] sm:$0xff] %v1190_v25  ;;  %v2116_v26 = vpack.c.bf16 %v1057_v23, %v1052_v24  ;;  %v1984_v18 = vpop.f32.mrb[24].mxu0  ;;  %v1233_v23 = vld [vmem:[%s3024_s10 + $0x10] sm:$0xff] }
 0x134   : > { %v1513_v17 = vadd.f32 %v1512_v46, %v1511_v6  ;;  %v1067_v32 = vadd.f32 %v1984_v18, %v2770_v20  ;;  %v1061_v34 = vpop.f32.mrb[25].mxu0  ;;  %v1231_v6 = vld [vmem:[%s3024_s10] sm:$0xff]  ;;  %v1234_v46 = vld [vmem:[%s3024_s10 + $0x18] sm:$0xff] }
 0x135   : > { %1259 = vxpose.xlu0.b32.cont [13/16] %v2711_v48, 128  ;;  %1559 = vst [vmem:[%s3027_s13] sm:$0x1] %v1558_v15  ;;  %v1189_v48 = vsel %vm1141_vm7, %v1052_v24, 0.0  ;;  %v1062_v35 = vadd.f32 %v2770_v20, %v1061_v34  ;;  %2118 = vmatprep.subr.msk.bf16.mxu1 %vm2117_vm3, %v2116_v26  ;;  %vm3035_vm7 = vcmp.lt.s32.totalorder %v2605_v0, 300  ;;  %v1232_v15 = vld [vmem:[%s3024_s10 + $0x8] sm:$0xff] }
 0x136   : > { %v1514_v30 = vrot.slane %v1513_v17, 2  ;;  %1221 = vst [vmem:[%s2263_s23 + $0x30] sm:$0xff] %v1189_v48  ;;  %v1192_v38 = vsel %vm1144_vm9, %v1067_v32, 0.0  ;;  %vm2141_vm8 = vmpackc.low %vm1150_vm15, %vm3035_vm7  ;;  %v1236_v48 = vld [vmem:[%s3024_s10 + $0x28] sm:$0xff] }
 0x137   : > { %2121 = vmatpush3.bf16.msk.msra.mxu1 %vm2117_vm3, %v2116_v26  ;;  %1224 = vst [vmem:[%s2263_s23 + $0x48] sm:$0xff] %v1192_v38  ;;  %v1191_v28 = vsel %vm1143_vm10, %v1062_v35, 0.0  ;;  %v1987_v40 = vpop.f32.mrb[26].mxu0  ;;  %vm3036_vm9 = vmmov %vm3035_vm7  ;;  %v1235_v26 = vld [vmem:[%s3024_s10 + $0x20] sm:$0xff] }
 0x138   : > { %v1515_v29 = vadd.f32 %v1514_v30, %v1513_v17  ;;  %1223 = vst [vmem:[%s2263_s23 + $0x40] sm:$0xff] %v1191_v28  ;;  %v1077_v41 = vadd.f32 %v1987_v40, %v2770_v20  ;;  %v1071_v42 = vpop.f32.mrb[27].mxu0 }
 0x139   : > { %1260 = vxpose.xlu0.b32.cont [14/16] %v2706_v5, 128  ;;  %v2122_v5 = vpack.c.bf16 %v1067_v32, %v1062_v35  ;;  %v1072_v44 = vadd.f32 %v2770_v20, %v1071_v42  ;;  %v1238_v35 = vld [vmem:[%s3024_s10 + $0x38] sm:$0xff] }
 0x13a   : > { %v1516_v61 = vrot.slane %v1515_v29, 1  ;;  %v1194_v45 = vsel %vm1146_vm11, %v1077_v41, 0.0 }
 0x13b   : > { %2124 = vmatprep.subr.msk.bf16.mxu1 %vm2123_vm4, %v2122_v5  ;;  %1226 = vst [vmem:[%s2263_s23 + $0x58] sm:$0xff] %v1194_v45  ;;  %v2128_v36 = vpack.c.bf16 %v1077_v41, %v1072_v44  ;;  %v1990_v9 = vpop.f32.mrb[28].mxu0  ;;  %v1239_v41 = vld [vmem:[%s3024_s10 + $0x40] sm:$0xff]  ;;  %v1242_v45 = vld [vmem:[%s3024_s10 + $0x58] sm:$0xff] }
 0x13c   : > { %v1517_v43 = vadd.f32 %v1516_v61, %v1515_v29  ;;  %2127 = vmatpush3.bf16.msk.msra.mxu1 %vm2123_vm4, %v2122_v5  ;;  %v1087_v51 = vadd.f32 %v1990_v9, %v2770_v20  ;;  %v1081_v52 = vpop.f32.mrb[29].mxu0  ;;  %v1237_v29 = vld [vmem:[%s3024_s10 + $0x30] sm:$0xff]  ;;  %v1240_v61 = vld [vmem:[%s3024_s10 + $0x48] sm:$0xff] }
 0x13d   : > { %1261 = vxpose.xlu0.b32.cont [15/16] %v2734_v10, 128  ;;  %v1193_v10 = vsel %vm1145_vm12, %v1072_v44, 0.0  ;;  %v1082_v53 = vadd.f32 %v2770_v20, %v1081_v52  ;;  %2130 = vmatprep.subr.msk.bf16.mxu1 %vm2129_vm5, %v2128_v36  ;;  %v1244_v52 = vld [vmem:[%s3024_s10 + $0x68] sm:$0xff] }
 0x13e   : > { %v1518_v47 = vadd.f32 %v1517_v43, %v1480_v31  ;;  %1225 = vst [vmem:[%s2263_s23 + $0x50] sm:$0xff] %v1193_v10  ;;  %v1196_v49 = vsel %vm1148_vm13, %v1087_v51, 0.0  ;;  %v1241_v10 = vld [vmem:[%s3024_s10 + $0x50] sm:$0xff] }
 0x13f   : > { %1228 = vst [vmem:[%s2263_s23 + $0x68] sm:$0xff] %v1196_v49  ;;  %v1195_v50 = vsel %vm1147_vm14, %v1082_v53, 0.0  ;;  %v1993_v14 = vpop.f32.mrb[30].mxu0 }
 0x140   : > { %1519 = vst [vmem:[%s3026_s12] sm:$0x1] %v1518_v47  ;;  %2133 = vmatpush3.bf16.msk.msra.mxu1 %vm2129_vm5, %v2128_v36  ;;  %1227 = vst [vmem:[%s2263_s23 + $0x60] sm:$0xff] %v1195_v50  ;;  %v1097_v56 = vadd.f32 %v1993_v14, %v2770_v20  ;;  %v1091_v13 = vpop.f32.mrb[31].mxu0 }
 0x141   : > { %1262 = vxpose.xlu0.b32.end [16/16] %v2729_v39, 128  ;;  %v2134_v39 = vpack.c.bf16 %v1087_v51, %v1082_v53  ;;  %v1092_v33 = vadd.f32 %v2770_v20, %v1091_v13  ;;  %v1243_v53 = vld [vmem:[%s3024_s10 + $0x60] sm:$0xff]  ;;  %v1245_v13 = vld [vmem:[%s3024_s10 + $0x70] sm:$0xff] }
 0x142   : > { %v1198_v57 = vsel %vm1150_vm15, %v1097_v56, 0.0 }
 0x143   : > { %2136 = vmatprep.subr.msk.bf16.mxu1 %vm2135_vm6, %v2134_v39  ;;  %1230 = vst [vmem:[%s2263_s23 + $0x78] sm:$0xff] %v1198_v57  ;;  %v1197_v54 = vsel %vm3036_vm9, %v1092_v33, 0.0  ;;  %v2140_v55 = vpack.c.bf16 %v1097_v56, %v1092_v33  ;;  %v1246_v56 = vld [vmem:[%s3024_s10 + $0x78] sm:$0xff] }
 0x144   : > { %2139 = vmatpush3.bf16.msk.msra.mxu1 %vm2135_vm6, %v2134_v39  ;;  %1229 = vst [vmem:[%s2263_s23 + $0x70] sm:$0xff] %v1197_v54 }
 0x145   : > { %2142 = vmatprep.subr.msk.bf16.mxu1 %vm2141_vm8, %v2140_v55 }
 0x148   : > { %2145 = vmatpush3.bf16.msk.msra.mxu1 %vm2141_vm8, %v2140_v55 }
 0x185   : > { %v1263_v58 = vpop.trf.xlu0 }
 0x186   : > { %2026 = vmatprep.mubr.f32.mxu1 %v1263_v58 }
 0x189   : > { %v1264_v20 = vpop.trf.xlu0 }
 0x18a   : > { %2027 = vmatmul.mubr.f32.vlgmr.msra.gmra.mrb[16].mxu1 %v1264_v20 }
 0x18d   : > { %v1265_v59 = vpop.trf.xlu0 }
 0x18e   : > { %2029 = vmatprep.mubr.f32.mxu1 %v1265_v59 }
 0x191   : > { %v1266_v60 = vpop.trf.xlu0 }
 0x192   : > { %2030 = vmatmul.mubr.f32.gmra.mrb[18].mxu1 %v1266_v60 }
 0x195   : > { %v1267_v62 = vpop.trf.xlu0 }
 0x196   : > { %2032 = vmatprep.mubr.f32.mxu1 %v1267_v62 }
 0x199   : > { %v1268_v37 = vpop.trf.xlu0 }
 0x19a   : > { %2033 = vmatmul.mubr.f32.gmra.mrb[20].mxu1 %v1268_v37 }
 0x19d   : > { %v1269_v63 = vpop.trf.xlu0 }
 0x19e   : > { %2035 = vmatprep.mubr.f32.mxu1 %v1269_v63 }
 0x1a1   : > { %v1270_v0 = vpop.trf.xlu0 }
 0x1a2   : > { %2036 = vmatmul.mubr.f32.gmra.mrb[22].mxu1 %v1270_v0 }
 0x1a5   : > { %v1271_v2 = vpop.trf.xlu0 }
 0x1a6   : > { %2038 = vmatprep.mubr.f32.mxu1 %v1271_v2 }
 0x1a9   : > { %v1272_v3 = vpop.trf.xlu0 }
 0x1aa   : > { %2039 = vmatmul.mubr.f32.gmra.mrb[24].mxu1 %v1272_v3 }
 0x1ad   : > { %v1273_v4 = vpop.trf.xlu0 }
 0x1ae   : > { %2041 = vmatprep.mubr.f32.mxu1 %v1273_v4 }
 0x1b1   : > { %v1274_v7 = vpop.trf.xlu0 }
 0x1b2   : > { %2042 = vmatmul.mubr.f32.gmra.mrb[26].mxu1 %v1274_v7 }
 0x1b5   : > { %v1275_v16 = vpop.trf.xlu0 }
 0x1b6   : > { %2044 = vmatprep.mubr.f32.mxu1 %v1275_v16 }
 0x1b9   : > { %v1276_v8 = vpop.trf.xlu0 }
 0x1ba   : > { %2045 = vmatmul.mubr.f32.gmra.mrb[28].mxu1 %v1276_v8 }
 0x1bd   : > { %v1277_v11 = vpop.trf.xlu0 }
 0x1be   : > { %2047 = vmatprep.mubr.f32.mxu1 %v1277_v11 }
 0x1c1   : > { %v1278_v1 = vpop.trf.xlu0 }
 0x1c2   : > { %2048 = vmatmul.mubr.f32.gmra.mrb[30].mxu1 %v1278_v1 }
 0x25d   : > { %v2028_v27 = vpop.f32.mrb[16].mxu1 }
 0x25e   : > { %v1425_v12 = vadd.f32 %v2028_v27, %v1232_v15  ;;  %v1345_v21 = vpop.f32.mrb[17].mxu1 }
 0x25f   : > { %v1424_v22 = vadd.f32 %v1345_v21, %v1231_v6 }
 0x260   : > { %1441 = vst [vmem:[%s3024_s10 + $0x8] sm:$0xff] %v1425_v12 }
 0x261   : > { %1440 = vst [vmem:[%s3024_s10] sm:$0xff] %v1424_v22 }
 0x265   : > { %v2031_v19 = vpop.f32.mrb[18].mxu1 }
 0x266   : > { %v1427_v24 = vadd.f32 %v2031_v19, %v1234_v46  ;;  %v1355_v17 = vpop.f32.mrb[19].mxu1 }
 0x267   : > { %v1426_v25 = vadd.f32 %v1355_v17, %v1233_v23 }
 0x268   : > { %1443 = vst [vmem:[%s3024_s10 + $0x18] sm:$0xff] %v1427_v24 }
 0x269   : > { %1442 = vst [vmem:[%s3024_s10 + $0x10] sm:$0xff] %v1426_v25 }
 0x26d   : > { %v2034_v18 = vpop.f32.mrb[20].mxu1 }
 0x26e   : > { %v1429_v30 = vadd.f32 %v2034_v18, %v1236_v48  ;;  %v1365_v32 = vpop.f32.mrb[21].mxu1 }
 0x26f   : > { %v1428_v34 = vadd.f32 %v1365_v32, %v1235_v26 }
 0x270   : > { %1445 = vst [vmem:[%s3024_s10 + $0x28] sm:$0xff] %v1429_v30 }
 0x271   : > { %1444 = vst [vmem:[%s3024_s10 + $0x20] sm:$0xff] %v1428_v34 }
 0x275   : > { %v2037_v38 = vpop.f32.mrb[22].mxu1 }
 0x276   : > { %v1431_v28 = vadd.f32 %v2037_v38, %v1238_v35  ;;  %v1375_v5 = vpop.f32.mrb[23].mxu1 }
 0x277   : > { %v1430_v40 = vadd.f32 %v1375_v5, %v1237_v29 }
 0x278   : > { %1447 = vst [vmem:[%s3024_s10 + $0x38] sm:$0xff] %v1431_v28 }
 0x279   : > { %1446 = vst [vmem:[%s3024_s10 + $0x30] sm:$0xff] %v1430_v40 }
 0x27d   : > { %v2040_v42 = vpop.f32.mrb[24].mxu1 }
 0x27e   : > { %v1433_v31 = vadd.f32 %v2040_v42, %v1240_v61  ;;  %v1385_v44 = vpop.f32.mrb[25].mxu1 }
 0x27f   : > { %v1432_v43 = vadd.f32 %v1385_v44, %v1239_v41 }
 0x280   : > { %1449 = vst [vmem:[%s3024_s10 + $0x48] sm:$0xff] %v1433_v31 }
 0x281   : > { %1448 = vst [vmem:[%s3024_s10 + $0x40] sm:$0xff] %v1432_v43 }
 0x285   : > { %v2043_v36 = vpop.f32.mrb[26].mxu1 }
 0x286   : > { %v1435_v9 = vadd.f32 %v2043_v36, %v1242_v45  ;;  %v1395_v47 = vpop.f32.mrb[27].mxu1 }
 0x287   : > { %v1434_v51 = vadd.f32 %v1395_v47, %v1241_v10 }
 0x288   : > { %1451 = vst [vmem:[%s3024_s10 + $0x58] sm:$0xff] %v1435_v9 }
 0x289   : > { %1450 = vst [vmem:[%s3024_s10 + $0x50] sm:$0xff] %v1434_v51 }
 0x28d   : > { %v2046_v49 = vpop.f32.mrb[28].mxu1 }
 0x28e   : > { %v1437_v50 = vadd.f32 %v2046_v49, %v1244_v52  ;;  %v1405_v39 = vpop.f32.mrb[29].mxu1 }
 0x28f   : > { %v1436_v14 = vadd.f32 %v1405_v39, %v1243_v53 }
 0x290   : > { %1453 = vst [vmem:[%s3024_s10 + $0x68] sm:$0xff] %v1437_v50 }
 0x291   : > { %1452 = vst [vmem:[%s3024_s10 + $0x60] sm:$0xff] %v1436_v14 }
 0x295   : > { %v2049_v33 = vpop.f32.mrb[30].mxu1 }
 0x296   : > { %v1439_v57 = vadd.f32 %v2049_v33, %v1246_v56  ;;  %v1415_v54 = vpop.f32.mrb[31].mxu1 }
 0x297   : > { %v1438_v55 = vadd.f32 %v1415_v54, %v1245_v13 }
 0x298   : > { %1455 = vst [vmem:[%s3024_s10 + $0x78] sm:$0xff] %v1439_v57 }
 0x299   : > { %1454 = vst [vmem:[%s3024_s10 + $0x70] sm:$0xff] %v1438_v55 }
 0x29a PF: > { %s24_s25 = sadd.s32 1, %s2161_s25  }
 0x29b   : > { %p21_p5 = scmp.ge.s32.totalorder %s24_s25, 5  }
 0x29d   :  { %23 = sbr.rel (!%p21_p5) target bundleno = 2 (0x2), region = 133 }

</bundles_post_ra>
